<compile_context>
chip_gen: v6e
topology: v6e:2x2x1
jax: 0.10.0
libtpu: 0.0.40
codegen_flags: <defaults>
</compile_context>

<pallas_src>
import numpy as np
import jax
import jax.numpy as jnp
from jax import lax
from jax.experimental import pallas as pl
from jax.experimental.pallas import tpu as pltpu

# ---------------- small, module-consistent sizes ----------------
VOCAB_SIZE = 512      # stands in for tokenizer.vocab_size (~50k in the original)
EMBEDDING_DIM = 128   # original: 256
HIDDEN_DIM = 128      # original: 512
BATCH = 8
T_PAD = 10            # padded sequence length of the input batch


# ---------------- tiling helpers ----------------
def _pick_t_tile(max_len, B, H, budget_bytes=8 << 20):
    """Time tile so 2 buffers of (T_TILE, B, 4H) bf16 stay well under budget
    (v7x scoped-VMEM friendly)."""
    per_step = B * 4 * H * 2                      # bf16 xproj bytes per time step
    t = max(1, budget_bytes // (2 * per_step))
    return int(min(max_len, t, 128))


def _pick_v_tile(V):
    """Large lane-dense fc tile (review: 2048-8192 at prod vocab)."""
    for cand in (8192, 4096, 2048, 1024, 512, 256, 128):
        if V % cand == 0 and cand <= V:
            return cand
    return V


def _fast_sigmoid(x):
    # sigmoid(x) = 0.5*tanh(0.5*x) + 0.5 : one EUP tanh; mul/add ride free VPU slots.
    return 0.5 * jnp.tanh(0.5 * x) + 0.5


# ---------------- Pallas kernels ----------------
def _make_recurrence_kernel(n_tiles, t_tile, last_steps, H, fuse_fc):
    """LSTM recurrence over a time-tiled grid.

    Grid: (n_tiles,) marked "arbitrary".  Per grid step the kernel sees one
    (t_tile, B, 4H) bf16 block of pre-activations; h (bf16) and c (f32) persist
    in VMEM scratch across grid steps.  On the last grid step the length mask is
    applied and either h_last (B, H) or the fused fc logits (B, V) are written.
    """

    def kernel(xproj_ref, whh_ref, mask_ref, *rest):
        if fuse_fc:
            wfc_ref, bfc_ref, out_ref, h_scr, c_scr = rest
        else:
            out_ref, h_scr, c_scr = rest

        pid = pl.program_id(0)

        @pl.when(pid == 0)
        def _init():
            h_scr[...] = jnp.zeros_like(h_scr)
            c_scr[...] = jnp.zeros_like(c_scr)

        w_hh = whh_ref[...]                       # (H, 4H) bf16, hoisted out of loop

        def run_steps(nsteps):
            def step(t, carry):
                h = h_scr[...]                    # bf16 carry: no per-step cast on
                c = c_scr[...]                    # the h -> matmul dependence chain
                gates = xproj_ref[t].astype(jnp.float32) + jnp.dot(
                    h, w_hh, preferred_element_type=jnp.float32)
                i_g = _fast_sigmoid(gates[:, 0 * H:1 * H])
                f_g = _fast_sigmoid(gates[:, 1 * H:2 * H])
                g_g = jnp.tanh(gates[:, 2 * H:3 * H])
                o_g = _fast_sigmoid(gates[:, 3 * H:4 * H])
                c_new = f_g * c + i_g * g_g
                h_new = o_g * jnp.tanh(c_new)
                c_scr[...] = c_new
                h_scr[...] = h_new.astype(jnp.bfloat16)
                return carry

            # Partial unroll: keeps LLO visibility for overlapping step t+1's matmul
            # with step t's EUP tail without bloating code at production T'.
            lax.fori_loop(0, nsteps, step, 0, unroll=min(nsteps, 8))

        if n_tiles == 1:
            run_steps(last_steps)
        else:
            @pl.when(pid < n_tiles - 1)
            def _full_tile():
                run_steps(t_tile)

            @pl.when(pid == n_tiles - 1)
            def _last_tile():
                run_steps(last_steps)

        @pl.when(pid == n_tiles - 1)
        def _finalize():
            # pad_packed_sequence: row T'-1 of the padded output is zero unless
            # length == T'.
            h_last = h_scr[...].astype(jnp.float32) * mask_ref[...]
            if fuse_fc:
                out_ref[...] = (jnp.dot(h_last.astype(jnp.bfloat16), wfc_ref[...],
                                        preferred_element_type=jnp.float32)
                                + bfc_ref[...])
            else:
                out_ref[...] = h_last

    return kernel


def fc_kernel(h_ref, wfc_ref, bfc_ref, out_ref):
    """One V-tile of the final Linear: (B, H) @ (H, TV) + (1, TV)."""
    out_ref[...] = (jnp.dot(h_ref[...].astype(jnp.bfloat16), wfc_ref[...],
                            preferred_element_type=jnp.float32)
                    + bfc_ref[...])


# ---------------- wrapper ----------------
def lstm_dqn_forward(params, x_tokens, lengths_host, *, t_tile=None, fuse_fc=None):
    """x_tokens: (B, T_pad) int32; lengths_host: host numpy (B,) ints."""
    B, _ = x_tokens.shape
    E = params["embedding"].shape[1]
    H = params["w_hh_t"].shape[0]
    V = params["w_fc_t"].shape[1]

    max_len = int(np.max(np.asarray(lengths_host)))             # T' (host, like PyTorch)
    if max_len == 0:
        # All-empty batch: h_last is all zeros -> logits are just the fc bias.
        return jnp.broadcast_to(params["b_fc"].astype(jnp.float32), (B, V))

    # Embedding gather (data-dependent) stays in XLA; gather directly on the
    # transposed token indices so the big embedded slab is born time-major.
    tokens_tm = jnp.transpose(x_tokens[:, :max_len])             # (T', B) int32 (tiny)
    emb_tm = params["embedding"][tokens_tm]                      # (T', B, E) f32

    # Hoisted input projection: one (T'*B, E) @ (E, 4H) bf16 matmul (f32 acc),
    # bias folded in, then stored bf16 (halves xproj HBM traffic).
    w_ih_bf = params["w_ih_t"].astype(jnp.bfloat16)
    xproj = jnp.dot(emb_tm.astype(jnp.bfloat16).reshape(max_len * B, E), w_ih_bf,
                    preferred_element_type=jnp.float32)
    xproj = (xproj + params["b_lstm"]).astype(jnp.bfloat16).reshape(max_len, B, 4 * H)

    w_hh_bf = params["w_hh_t"].astype(jnp.bfloat16)
    w_fc_bf = params["w_fc_t"].astype(jnp.bfloat16)
    b_fc = params["b_fc"].astype(jnp.float32)

    # pad_packed_sequence mask, precomputed once (no per-step compare in-kernel).
    mask = (jnp.asarray(np.asarray(lengths_host), jnp.int32) == max_len)
    mask = mask.astype(jnp.float32).reshape(B, 1)

    # ---- time tiling (bounds VMEM; auto double-buffers xproj DMA) ----
    if t_tile is None:
        t_tile = _pick_t_tile(max_len, B, H)
    t_tile = int(min(t_tile, max_len))
    n_tiles = -(-max_len // t_tile)
    last_steps = max_len - (n_tiles - 1) * t_tile
    t_padded = n_tiles * t_tile
    if t_padded != max_len:
        xproj = jnp.pad(xproj, ((0, t_padded - max_len), (0, 0), (0, 0)))

    if fuse_fc is None:
        # Fuse fc when W_fc^T bf16 is comfortably VMEM-resident (toy config);
        # at production vocab (~50k) use the separately tiled fc kernel.
        fuse_fc = (H * V * 2) <= (4 << 20)

    common_in_specs = [
        pl.BlockSpec((t_tile, B, 4 * H), lambda t: (t, 0, 0)),   # xproj time tile (bf16)
        pl.BlockSpec((H, 4 * H), lambda t: (0, 0)),              # W_hh^T (bf16)
        pl.BlockSpec((B, 1), lambda t: (0, 0)),                  # length mask (f32)
    ]
    scratch = [pltpu.VMEM((B, H), jnp.bfloat16),                 # h carry (bf16)
               pltpu.VMEM((B, H), jnp.float32)]                  # c carry (f32)

    if fuse_fc:
        kernel = _make_recurrence_kernel(n_tiles, t_tile, last_steps, H, fuse_fc=True)
        logits = pl.pallas_call(
            kernel,
            out_shape=jax.ShapeDtypeStruct((B, V), jnp.float32),
            grid=(n_tiles,),
            in_specs=common_in_specs + [
                pl.BlockSpec((H, V), lambda t: (0, 0)),          # W_fc^T (bf16, resident)
                pl.BlockSpec((1, V), lambda t: (0, 0)),          # b_fc
            ],
            out_specs=pl.BlockSpec((B, V), lambda t: (0, 0)),
            scratch_shapes=scratch,
            compiler_params=pltpu.CompilerParams(
                dimension_semantics=("arbitrary",)),
        )(xproj, w_hh_bf, mask, w_fc_bf, b_fc)
        return logits

    # ---- kernel 1: time-tiled serial LSTM recurrence -> masked h_last ----
    kernel = _make_recurrence_kernel(n_tiles, t_tile, last_steps, H, fuse_fc=False)
    h_last = pl.pallas_call(
        kernel,
        out_shape=jax.ShapeDtypeStruct((B, H), jnp.float32),
        grid=(n_tiles,),
        in_specs=common_in_specs,
        out_specs=pl.BlockSpec((B, H), lambda t: (0, 0)),
        scratch_shapes=scratch,
        compiler_params=pltpu.CompilerParams(
            dimension_semantics=("arbitrary",)),
    )(xproj, w_hh_bf, mask)

    # ---- kernel 2: fc, large lane-dense V tiles ("parallel" -> megacore on v7x) ----
    v_tile = _pick_v_tile(V)
    logits = pl.pallas_call(
        fc_kernel,
        out_shape=jax.ShapeDtypeStruct((B, V), jnp.float32),
        grid=(V // v_tile,),
        in_specs=[
            pl.BlockSpec((B, H), lambda j: (0, 0)),              # masked h_last
            pl.BlockSpec((H, v_tile), lambda j: (0, j)),         # W_fc^T tile (bf16)
            pl.BlockSpec((1, v_tile), lambda j: (0, j)),         # b_fc tile
        ],
        out_specs=pl.BlockSpec((B, v_tile), lambda j: (0, j)),
        compiler_params=pltpu.CompilerParams(
            dimension_semantics=("parallel",)),
    )(h_last, w_fc_bf, b_fc)
    return logits


# ---------------- pure-JAX reference (same bf16 matmul/xproj policy) ----------------
def reference_forward(params, x_tokens, lengths_host):
    B = x_tokens.shape[0]
    E = params["embedding"].shape[1]
    H = params["w_hh_t"].shape[0]
    V = params["w_fc_t"].shape[1]
    max_len = int(np.max(np.asarray(lengths_host)))
    if max_len == 0:
        return jnp.broadcast_to(params["b_fc"].astype(jnp.float32), (B, V))

    tokens_tm = jnp.transpose(x_tokens[:, :max_len])
    emb_tm = params["embedding"][tokens_tm]                      # (T', B, E)

    w_ih_bf = params["w_ih_t"].astype(jnp.bfloat16)
    w_hh_bf = params["w_hh_t"].astype(jnp.bfloat16)
    w_fc_bf = params["w_fc_t"].astype(jnp.bfloat16)

    xproj = jnp.dot(emb_tm.astype(jnp.bfloat16).reshape(max_len * B, E), w_ih_bf,
                    preferred_element_type=jnp.float32)
    xproj = (xproj + params["b_lstm"]).astype(jnp.bfloat16).reshape(max_len, B, 4 * H)

    def step(carry, xp_t):
        h, c = carry
        gates = xp_t.astype(jnp.float32) + jnp.dot(h.astype(jnp.bfloat16), w_hh_bf,
                                                   preferred_element_type=jnp.float32)
        i = jax.nn.sigmoid(gates[:, 0 * H:1 * H])
        f = jax.nn.sigmoid(gates[:, 1 * H:2 * H])
        g = jnp.tanh(gates[:, 2 * H:3 * H])
        o = jax.nn.sigmoid(gates[:, 3 * H:4 * H])
        c_new = f * c + i * g
        h_new = o * jnp.tanh(c_new)
        return (h_new, c_new), None

    init = (jnp.zeros((B, H), jnp.float32), jnp.zeros((B, H), jnp.float32))
    (h_last, _), _ = lax.scan(step, init, xproj)

    valid = (jnp.asarray(np.asarray(lengths_host), jnp.int32) == max_len)
    h_last = h_last * valid.astype(jnp.float32)[:, None]
    return (jnp.dot(h_last.astype(jnp.bfloat16), w_fc_bf,
                    preferred_element_type=jnp.float32)
            + params["b_fc"])


# ---------------- main ----------------
if __name__ == "__main__":
    key = jax.random.PRNGKey(0)
    ks = jax.random.split(key, 8)

    E, H, V = EMBEDDING_DIM, HIDDEN_DIM, VOCAB_SIZE
    params = {
        "embedding": jax.random.normal(ks[0], (V, E), jnp.float32),
        "w_ih_t": 0.05 * jax.random.normal(ks[1], (E, 4 * H), jnp.float32),
        "w_hh_t": 0.05 * jax.random.normal(ks[2], (H, 4 * H), jnp.float32),
        "b_lstm": 0.05 * jax.random.normal(ks[3], (1, 4 * H), jnp.float32),  # b_ih + b_hh
        "w_fc_t": 0.05 * jax.random.normal(ks[4], (H, V), jnp.float32),
        "b_fc": 0.05 * jax.random.normal(ks[5], (1, V), jnp.float32),
    }

    x_tokens = jax.random.randint(ks[6], (BATCH, T_PAD), 0, V, dtype=jnp.int32)
    lengths_host = np.array([8, 5, 8, 3, 7, 8, 2, 6], dtype=np.int32)  # max = 8 < T_PAD

    ref = jax.block_until_ready(reference_forward(params, x_tokens, lengths_host))

    # Path 1 (toy / small vocab): fused fc, multi-time-tile grid with a remainder tile.
    out_fused = jax.block_until_ready(
        lstm_dqn_forward(params, x_tokens, lengths_host, t_tile=3, fuse_fc=True))
    np.testing.assert_allclose(np.asarray(out_fused), np.asarray(ref),
                               rtol=1e-2, atol=1e-2)

    # Path 2 (production-vocab structure): recurrence -> h_last, separate V-tiled fc.
    out_tiled = jax.block_until_ready(
        lstm_dqn_forward(params, x_tokens, lengths_host, fuse_fc=False))
    np.testing.assert_allclose(np.asarray(out_tiled), np.asarray(ref),
                               rtol=1e-2, atol=1e-2)

    print("KERNEL_OK")
</pallas_src>

<mosaic_0001>
module attributes {stable_mosaic.version = 11 : i64} {
  func.func @kernel(%arg0: i32, %arg1: memref<3x8x512xbf16, #tpu.memory_space<vmem>>, %arg2: memref<128x512xbf16, #tpu.memory_space<vmem>>, %arg3: memref<8x1xf32, #tpu.memory_space<vmem>>, %arg4: memref<128x512xbf16, #tpu.memory_space<vmem>>, %arg5: memref<1x512xf32, #tpu.memory_space<vmem>>, %arg6: memref<8x512xf32, #tpu.memory_space<vmem>>, %arg7: memref<8x128xbf16, #tpu.memory_space<vmem>>, %arg8: memref<8x128xf32, #tpu.memory_space<vmem>>) attributes {dimension_semantics = [#tpu.dimension_semantics<arbitrary>], iteration_bounds = array<i64: 3>, scalar_prefetch = 0 : i64, scratch_operands = 2 : i64, tpu.core_type = #tpu.core_type<tc>, window_params = [{transform_indices = @transform_0, window_bounds = array<i64: 3, 8, 512>}, {pipeline_mode = #tpu.pipeline_mode<synchronous>, transform_indices = @transform_1, window_bounds = array<i64: 128, 512>}, {pipeline_mode = #tpu.pipeline_mode<synchronous>, transform_indices = @transform_2, window_bounds = array<i64: 8, 1>}, {pipeline_mode = #tpu.pipeline_mode<synchronous>, transform_indices = @transform_3, window_bounds = array<i64: 128, 512>}, {pipeline_mode = #tpu.pipeline_mode<synchronous>, transform_indices = @transform_4, window_bounds = array<i64: 1, 512>}, {pipeline_mode = #tpu.pipeline_mode<synchronous>, transform_indices = @transform_5, window_bounds = array<i64: 8, 512>}]} {
    %c0_i32 = arith.constant 0 : i32
    %0 = arith.cmpi eq, %arg0, %c0_i32 : i32
    %1 = arith.extui %0 : i1 to i32
    %c0_i32_0 = arith.constant 0 : i32
    %2 = arith.cmpi ne, %1, %c0_i32_0 : i32
    scf.if %2 {
      %cst = arith.constant 0.000000e+00 : bf16
      %13 = vector.broadcast %cst : bf16 to vector<8x128xbf16>
      %c0_7 = arith.constant 0 : index
      %c0_8 = arith.constant 0 : index
      %14 = vector.load %arg7[%c0_7, %c0_8] : memref<8x128xbf16, #tpu.memory_space<vmem>>, vector<8x128xbf16>
      tpu.vector_store %arg7[%c0_7, %c0_8], %13 {strides = array<i32>} : memref<8x128xbf16, #tpu.memory_space<vmem>>, vector<8x128xbf16>,
      %cst_9 = arith.constant 0.000000e+00 : f32
      %15 = vector.broadcast %cst_9 : f32 to vector<8x128xf32>
      %c0_10 = arith.constant 0 : index
      %c0_11 = arith.constant 0 : index
      %16 = vector.load %arg8[%c0_10, %c0_11] : memref<8x128xf32, #tpu.memory_space<vmem>>, vector<8x128xf32>
      tpu.vector_store %arg8[%c0_10, %c0_11], %15 {strides = array<i32>} : memref<8x128xf32, #tpu.memory_space<vmem>>, vector<8x128xf32>,
    } else {
    }
    %c0 = arith.constant 0 : index
    %c0_1 = arith.constant 0 : index
    %3 = vector.load %arg2[%c0, %c0_1] : memref<128x512xbf16, #tpu.memory_space<vmem>>, vector<128x512xbf16>
    %c2_i32 = arith.constant 2 : i32
    %4 = arith.cmpi slt, %arg0, %c2_i32 : i32
    %5 = arith.extui %4 : i1 to i32
    %c0_i32_2 = arith.constant 0 : i32
    %6 = arith.cmpi ne, %5, %c0_i32_2 : i32
    scf.if %6 {
      %c0_i32_7 = arith.constant 0 : i32
      %c0_8 = arith.constant 0 : index
      %c0_9 = arith.constant 0 : index
      %13 = vector.load %arg7[%c0_8, %c0_9] : memref<8x128xbf16, #tpu.memory_space<vmem>>, vector<8x128xbf16>
      %c0_10 = arith.constant 0 : index
      %c0_11 = arith.constant 0 : index
      %14 = vector.load %arg8[%c0_10, %c0_11] : memref<8x128xf32, #tpu.memory_space<vmem>>, vector<8x128xf32>
      %15 = arith.index_cast %c0_i32_7 : i32 to index
      %c0_12 = arith.constant 0 : index
      %c0_13 = arith.constant 0 : index
      %16 = vector.load %arg1[%15, %c0_12, %c0_13] : memref<3x8x512xbf16, #tpu.memory_space<vmem>>, vector<1x8x512xbf16>
      %17 = vector.shape_cast %16 : vector<1x8x512xbf16> to vector<8x512xbf16>
      %18 = arith.extf %17 : vector<8x512xbf16> to vector<8x512xf32>
      %cst = arith.constant dense<0.000000e+00> : vector<8x512xf32>
      %19 = tpu.matmul %13, %3, %cst {dimension_numbers = #tpu.dot_dimension_numbers<[1], [0], [0], [1], [0, 0, 1, 1], [], []>} : vector<8x128xbf16>, vector<128x512xbf16>, vector<8x512xf32> -> vector<8x512xf32>
      %20 = arith.addf %18, %19 : vector<8x512xf32>
      %21 = vector.extract_strided_slice %20 {offsets = [0, 0], sizes = [8, 128], strides = [1, 1]} : vector<8x512xf32> to vector<8x128xf32>
      %cst_14 = arith.constant 5.000000e-01 : f32
      %22 = vector.broadcast %cst_14 : f32 to vector<8x128xf32>
      %23 = arith.mulf %22, %21 : vector<8x128xf32>
      %24 = math.tanh %23 : vector<8x128xf32>
      %cst_15 = arith.constant 5.000000e-01 : f32
      %25 = vector.broadcast %cst_15 : f32 to vector<8x128xf32>
      %26 = arith.mulf %25, %24 : vector<8x128xf32>
      %cst_16 = arith.constant 5.000000e-01 : f32
      %27 = vector.broadcast %cst_16 : f32 to vector<8x128xf32>
      %28 = arith.addf %26, %27 : vector<8x128xf32>
      %29 = vector.extract_strided_slice %20 {offsets = [0, 128], sizes = [8, 128], strides = [1, 1]} : vector<8x512xf32> to vector<8x128xf32>
      %cst_17 = arith.constant 5.000000e-01 : f32
      %30 = vector.broadcast %cst_17 : f32 to vector<8x128xf32>
      %31 = arith.mulf %30, %29 : vector<8x128xf32>
      %32 = math.tanh %31 : vector<8x128xf32>
      %cst_18 = arith.constant 5.000000e-01 : f32
      %33 = vector.broadcast %cst_18 : f32 to vector<8x128xf32>
      %34 = arith.mulf %33, %32 : vector<8x128xf32>
      %cst_19 = arith.constant 5.000000e-01 : f32
      %35 = vector.broadcast %cst_19 : f32 to vector<8x128xf32>
      %36 = arith.addf %34, %35 : vector<8x128xf32>
      %37 = vector.extract_strided_slice %20 {offsets = [0, 256], sizes = [8, 128], strides = [1, 1]} : vector<8x512xf32> to vector<8x128xf32>
      %38 = math.tanh %37 : vector<8x128xf32>
      %39 = vector.extract_strided_slice %20 {offsets = [0, 384], sizes = [8, 128], strides = [1, 1]} : vector<8x512xf32> to vector<8x128xf32>
      %cst_20 = arith.constant 5.000000e-01 : f32
      %40 = vector.broadcast %cst_20 : f32 to vector<8x128xf32>
      %41 = arith.mulf %40, %39 : vector<8x128xf32>
      %42 = math.tanh %41 : vector<8x128xf32>
      %cst_21 = arith.constant 5.000000e-01 : f32
      %43 = vector.broadcast %cst_21 : f32 to vector<8x128xf32>
      %44 = arith.mulf %43, %42 : vector<8x128xf32>
      %cst_22 = arith.constant 5.000000e-01 : f32
      %45 = vector.broadcast %cst_22 : f32 to vector<8x128xf32>
      %46 = arith.addf %44, %45 : vector<8x128xf32>
      %47 = arith.mulf %36, %14 : vector<8x128xf32>
      %48 = arith.mulf %28, %38 : vector<8x128xf32>
      %49 = arith.addf %47, %48 : vector<8x128xf32>
      %50 = math.tanh %49 : vector<8x128xf32>
      %51 = arith.mulf %46, %50 : vector<8x128xf32>
      %c0_23 = arith.constant 0 : index
      %c0_24 = arith.constant 0 : index
      %52 = vector.load %arg8[%c0_23, %c0_24] : memref<8x128xf32, #tpu.memory_space<vmem>>, vector<8x128xf32>
      tpu.vector_store %arg8[%c0_23, %c0_24], %49 {strides = array<i32>} : memref<8x128xf32, #tpu.memory_space<vmem>>, vector<8x128xf32>,
      %53 = arith.truncf %51 : vector<8x128xf32> to vector<8x128xbf16>
      %c0_25 = arith.constant 0 : index
      %c0_26 = arith.constant 0 : index
      %54 = vector.load %arg7[%c0_25, %c0_26] : memref<8x128xbf16, #tpu.memory_space<vmem>>, vector<8x128xbf16>
      tpu.vector_store %arg7[%c0_25, %c0_26], %53 {strides = array<i32>} : memref<8x128xbf16, #tpu.memory_space<vmem>>, vector<8x128xbf16>,
      %c1_i32 = arith.constant 1 : i32
      %c0_27 = arith.constant 0 : index
      %c0_28 = arith.constant 0 : index
      %55 = vector.load %arg7[%c0_27, %c0_28] : memref<8x128xbf16, #tpu.memory_space<vmem>>, vector<8x128xbf16>
      %c0_29 = arith.constant 0 : index
      %c0_30 = arith.constant 0 : index
      %56 = vector.load %arg8[%c0_29, %c0_30] : memref<8x128xf32, #tpu.memory_space<vmem>>, vector<8x128xf32>
      %57 = arith.index_cast %c1_i32 : i32 to index
      %c0_31 = arith.constant 0 : index
      %c0_32 = arith.constant 0 : index
      %58 = vector.load %arg1[%57, %c0_31, %c0_32] : memref<3x8x512xbf16, #tpu.memory_space<vmem>>, vector<1x8x512xbf16>
      %59 = vector.shape_cast %58 : vector<1x8x512xbf16> to vector<8x512xbf16>
      %60 = arith.extf %59 : vector<8x512xbf16> to vector<8x512xf32>
      %cst_33 = arith.constant dense<0.000000e+00> : vector<8x512xf32>
      %61 = tpu.matmul %55, %3, %cst_33 {dimension_numbers = #tpu.dot_dimension_numbers<[1], [0], [0], [1], [0, 0, 1, 1], [], []>} : vector<8x128xbf16>, vector<128x512xbf16>, vector<8x512xf32> -> vector<8x512xf32>
      %62 = arith.addf %60, %61 : vector<8x512xf32>
      %63 = vector.extract_strided_slice %62 {offsets = [0, 0], sizes = [8, 128], strides = [1, 1]} : vector<8x512xf32> to vector<8x128xf32>
      %cst_34 = arith.constant 5.000000e-01 : f32
      %64 = vector.broadcast %cst_34 : f32 to vector<8x128xf32>
      %65 = arith.mulf %64, %63 : vector<8x128xf32>
      %66 = math.tanh %65 : vector<8x128xf32>
      %cst_35 = arith.constant 5.000000e-01 : f32
      %67 = vector.broadcast %cst_35 : f32 to vector<8x128xf32>
      %68 = arith.mulf %67, %66 : vector<8x128xf32>
      %cst_36 = arith.constant 5.000000e-01 : f32
      %69 = vector.broadcast %cst_36 : f32 to vector<8x128xf32>
      %70 = arith.addf %68, %69 : vector<8x128xf32>
      %71 = vector.extract_strided_slice %62 {offsets = [0, 128], sizes = [8, 128], strides = [1, 1]} : vector<8x512xf32> to vector<8x128xf32>
      %cst_37 = arith.constant 5.000000e-01 : f32
      %72 = vector.broadcast %cst_37 : f32 to vector<8x128xf32>
      %73 = arith.mulf %72, %71 : vector<8x128xf32>
      %74 = math.tanh %73 : vector<8x128xf32>
      %cst_38 = arith.constant 5.000000e-01 : f32
      %75 = vector.broadcast %cst_38 : f32 to vector<8x128xf32>
      %76 = arith.mulf %75, %74 : vector<8x128xf32>
      %cst_39 = arith.constant 5.000000e-01 : f32
      %77 = vector.broadcast %cst_39 : f32 to vector<8x128xf32>
      %78 = arith.addf %76, %77 : vector<8x128xf32>
      %79 = vector.extract_strided_slice %62 {offsets = [0, 256], sizes = [8, 128], strides = [1, 1]} : vector<8x512xf32> to vector<8x128xf32>
      %80 = math.tanh %79 : vector<8x128xf32>
      %81 = vector.extract_strided_slice %62 {offsets = [0, 384], sizes = [8, 128], strides = [1, 1]} : vector<8x512xf32> to vector<8x128xf32>
      %cst_40 = arith.constant 5.000000e-01 : f32
      %82 = vector.broadcast %cst_40 : f32 to vector<8x128xf32>
      %83 = arith.mulf %82, %81 : vector<8x128xf32>
      %84 = math.tanh %83 : vector<8x128xf32>
      %cst_41 = arith.constant 5.000000e-01 : f32
      %85 = vector.broadcast %cst_41 : f32 to vector<8x128xf32>
      %86 = arith.mulf %85, %84 : vector<8x128xf32>
      %cst_42 = arith.constant 5.000000e-01 : f32
      %87 = vector.broadcast %cst_42 : f32 to vector<8x128xf32>
      %88 = arith.addf %86, %87 : vector<8x128xf32>
      %89 = arith.mulf %78, %56 : vector<8x128xf32>
      %90 = arith.mulf %70, %80 : vector<8x128xf32>
      %91 = arith.addf %89, %90 : vector<8x128xf32>
      %92 = math.tanh %91 : vector<8x128xf32>
      %93 = arith.mulf %88, %92 : vector<8x128xf32>
      %c0_43 = arith.constant 0 : index
      %c0_44 = arith.constant 0 : index
      %94 = vector.load %arg8[%c0_43, %c0_44] : memref<8x128xf32, #tpu.memory_space<vmem>>, vector<8x128xf32>
      tpu.vector_store %arg8[%c0_43, %c0_44], %91 {strides = array<i32>} : memref<8x128xf32, #tpu.memory_space<vmem>>, vector<8x128xf32>,
      %95 = arith.truncf %93 : vector<8x128xf32> to vector<8x128xbf16>
      %c0_45 = arith.constant 0 : index
      %c0_46 = arith.constant 0 : index
      %96 = vector.load %arg7[%c0_45, %c0_46] : memref<8x128xbf16, #tpu.memory_space<vmem>>, vector<8x128xbf16>
      tpu.vector_store %arg7[%c0_45, %c0_46], %95 {strides = array<i32>} : memref<8x128xbf16, #tpu.memory_space<vmem>>, vector<8x128xbf16>,
      %c2_i32_47 = arith.constant 2 : i32
      %c0_48 = arith.constant 0 : index
      %c0_49 = arith.constant 0 : index
      %97 = vector.load %arg7[%c0_48, %c0_49] : memref<8x128xbf16, #tpu.memory_space<vmem>>, vector<8x128xbf16>
      %c0_50 = arith.constant 0 : index
      %c0_51 = arith.constant 0 : index
      %98 = vector.load %arg8[%c0_50, %c0_51] : memref<8x128xf32, #tpu.memory_space<vmem>>, vector<8x128xf32>
      %99 = arith.index_cast %c2_i32_47 : i32 to index
      %c0_52 = arith.constant 0 : index
      %c0_53 = arith.constant 0 : index
      %100 = vector.load %arg1[%99, %c0_52, %c0_53] : memref<3x8x512xbf16, #tpu.memory_space<vmem>>, vector<1x8x512xbf16>
      %101 = vector.shape_cast %100 : vector<1x8x512xbf16> to vector<8x512xbf16>
      %102 = arith.extf %101 : vector<8x512xbf16> to vector<8x512xf32>
      %cst_54 = arith.constant dense<0.000000e+00> : vector<8x512xf32>
      %103 = tpu.matmul %97, %3, %cst_54 {dimension_numbers = #tpu.dot_dimension_numbers<[1], [0], [0], [1], [0, 0, 1, 1], [], []>} : vector<8x128xbf16>, vector<128x512xbf16>, vector<8x512xf32> -> vector<8x512xf32>
      %104 = arith.addf %102, %103 : vector<8x512xf32>
      %105 = vector.extract_strided_slice %104 {offsets = [0, 0], sizes = [8, 128], strides = [1, 1]} : vector<8x512xf32> to vector<8x128xf32>
      %cst_55 = arith.constant 5.000000e-01 : f32
      %106 = vector.broadcast %cst_55 : f32 to vector<8x128xf32>
      %107 = arith.mulf %106, %105 : vector<8x128xf32>
      %108 = math.tanh %107 : vector<8x128xf32>
      %cst_56 = arith.constant 5.000000e-01 : f32
      %109 = vector.broadcast %cst_56 : f32 to vector<8x128xf32>
      %110 = arith.mulf %109, %108 : vector<8x128xf32>
      %cst_57 = arith.constant 5.000000e-01 : f32
      %111 = vector.broadcast %cst_57 : f32 to vector<8x128xf32>
      %112 = arith.addf %110, %111 : vector<8x128xf32>
      %113 = vector.extract_strided_slice %104 {offsets = [0, 128], sizes = [8, 128], strides = [1, 1]} : vector<8x512xf32> to vector<8x128xf32>
      %cst_58 = arith.constant 5.000000e-01 : f32
      %114 = vector.broadcast %cst_58 : f32 to vector<8x128xf32>
      %115 = arith.mulf %114, %113 : vector<8x128xf32>
      %116 = math.tanh %115 : vector<8x128xf32>
      %cst_59 = arith.constant 5.000000e-01 : f32
      %117 = vector.broadcast %cst_59 : f32 to vector<8x128xf32>
      %118 = arith.mulf %117, %116 : vector<8x128xf32>
      %cst_60 = arith.constant 5.000000e-01 : f32
      %119 = vector.broadcast %cst_60 : f32 to vector<8x128xf32>
      %120 = arith.addf %118, %119 : vector<8x128xf32>
      %121 = vector.extract_strided_slice %104 {offsets = [0, 256], sizes = [8, 128], strides = [1, 1]} : vector<8x512xf32> to vector<8x128xf32>
      %122 = math.tanh %121 : vector<8x128xf32>
      %123 = vector.extract_strided_slice %104 {offsets = [0, 384], sizes = [8, 128], strides = [1, 1]} : vector<8x512xf32> to vector<8x128xf32>
      %cst_61 = arith.constant 5.000000e-01 : f32
      %124 = vector.broadcast %cst_61 : f32 to vector<8x128xf32>
      %125 = arith.mulf %124, %123 : vector<8x128xf32>
      %126 = math.tanh %125 : vector<8x128xf32>
      %cst_62 = arith.constant 5.000000e-01 : f32
      %127 = vector.broadcast %cst_62 : f32 to vector<8x128xf32>
      %128 = arith.mulf %127, %126 : vector<8x128xf32>
      %cst_63 = arith.constant 5.000000e-01 : f32
      %129 = vector.broadcast %cst_63 : f32 to vector<8x128xf32>
      %130 = arith.addf %128, %129 : vector<8x128xf32>
      %131 = arith.mulf %120, %98 : vector<8x128xf32>
      %132 = arith.mulf %112, %122 : vector<8x128xf32>
      %133 = arith.addf %131, %132 : vector<8x128xf32>
      %134 = math.tanh %133 : vector<8x128xf32>
      %135 = arith.mulf %130, %134 : vector<8x128xf32>
      %c0_64 = arith.constant 0 : index
      %c0_65 = arith.constant 0 : index
      %136 = vector.load %arg8[%c0_64, %c0_65] : memref<8x128xf32, #tpu.memory_space<vmem>>, vector<8x128xf32>
      tpu.vector_store %arg8[%c0_64, %c0_65], %133 {strides = array<i32>} : memref<8x128xf32, #tpu.memory_space<vmem>>, vector<8x128xf32>,
      %137 = arith.truncf %135 : vector<8x128xf32> to vector<8x128xbf16>
      %c0_66 = arith.constant 0 : index
      %c0_67 = arith.constant 0 : index
      %138 = vector.load %arg7[%c0_66, %c0_67] : memref<8x128xbf16, #tpu.memory_space<vmem>>, vector<8x128xbf16>
      tpu.vector_store %arg7[%c0_66, %c0_67], %137 {strides = array<i32>} : memref<8x128xbf16, #tpu.memory_space<vmem>>, vector<8x128xbf16>,
      %c3_i32 = arith.constant 3 : i32
    } else {
    }
    %c2_i32_3 = arith.constant 2 : i32
    %7 = arith.cmpi eq, %arg0, %c2_i32_3 : i32
    %8 = arith.extui %7 : i1 to i32
    %c0_i32_4 = arith.constant 0 : i32
    %9 = arith.cmpi ne, %8, %c0_i32_4 : i32
    scf.if %9 {
      %c0_i32_7 = arith.constant 0 : i32
      %c0_8 = arith.constant 0 : index
      %c0_9 = arith.constant 0 : index
      %13 = vector.load %arg7[%c0_8, %c0_9] : memref<8x128xbf16, #tpu.memory_space<vmem>>, vector<8x128xbf16>
      %c0_10 = arith.constant 0 : index
      %c0_11 = arith.constant 0 : index
      %14 = vector.load %arg8[%c0_10, %c0_11] : memref<8x128xf32, #tpu.memory_space<vmem>>, vector<8x128xf32>
      %15 = arith.index_cast %c0_i32_7 : i32 to index
      %c0_12 = arith.constant 0 : index
      %c0_13 = arith.constant 0 : index
      %16 = vector.load %arg1[%15, %c0_12, %c0_13] : memref<3x8x512xbf16, #tpu.memory_space<vmem>>, vector<1x8x512xbf16>
      %17 = vector.shape_cast %16 : vector<1x8x512xbf16> to vector<8x512xbf16>
      %18 = arith.extf %17 : vector<8x512xbf16> to vector<8x512xf32>
      %cst = arith.constant dense<0.000000e+00> : vector<8x512xf32>
      %19 = tpu.matmul %13, %3, %cst {dimension_numbers = #tpu.dot_dimension_numbers<[1], [0], [0], [1], [0, 0, 1, 1], [], []>} : vector<8x128xbf16>, vector<128x512xbf16>, vector<8x512xf32> -> vector<8x512xf32>
      %20 = arith.addf %18, %19 : vector<8x512xf32>
      %21 = vector.extract_strided_slice %20 {offsets = [0, 0], sizes = [8, 128], strides = [1, 1]} : vector<8x512xf32> to vector<8x128xf32>
      %cst_14 = arith.constant 5.000000e-01 : f32
      %22 = vector.broadcast %cst_14 : f32 to vector<8x128xf32>
      %23 = arith.mulf %22, %21 : vector<8x128xf32>
      %24 = math.tanh %23 : vector<8x128xf32>
      %cst_15 = arith.constant 5.000000e-01 : f32
      %25 = vector.broadcast %cst_15 : f32 to vector<8x128xf32>
      %26 = arith.mulf %25, %24 : vector<8x128xf32>
      %cst_16 = arith.constant 5.000000e-01 : f32
      %27 = vector.broadcast %cst_16 : f32 to vector<8x128xf32>
      %28 = arith.addf %26, %27 : vector<8x128xf32>
      %29 = vector.extract_strided_slice %20 {offsets = [0, 128], sizes = [8, 128], strides = [1, 1]} : vector<8x512xf32> to vector<8x128xf32>
      %cst_17 = arith.constant 5.000000e-01 : f32
      %30 = vector.broadcast %cst_17 : f32 to vector<8x128xf32>
      %31 = arith.mulf %30, %29 : vector<8x128xf32>
      %32 = math.tanh %31 : vector<8x128xf32>
      %cst_18 = arith.constant 5.000000e-01 : f32
      %33 = vector.broadcast %cst_18 : f32 to vector<8x128xf32>
      %34 = arith.mulf %33, %32 : vector<8x128xf32>
      %cst_19 = arith.constant 5.000000e-01 : f32
      %35 = vector.broadcast %cst_19 : f32 to vector<8x128xf32>
      %36 = arith.addf %34, %35 : vector<8x128xf32>
      %37 = vector.extract_strided_slice %20 {offsets = [0, 256], sizes = [8, 128], strides = [1, 1]} : vector<8x512xf32> to vector<8x128xf32>
      %38 = math.tanh %37 : vector<8x128xf32>
      %39 = vector.extract_strided_slice %20 {offsets = [0, 384], sizes = [8, 128], strides = [1, 1]} : vector<8x512xf32> to vector<8x128xf32>
      %cst_20 = arith.constant 5.000000e-01 : f32
      %40 = vector.broadcast %cst_20 : f32 to vector<8x128xf32>
      %41 = arith.mulf %40, %39 : vector<8x128xf32>
      %42 = math.tanh %41 : vector<8x128xf32>
      %cst_21 = arith.constant 5.000000e-01 : f32
      %43 = vector.broadcast %cst_21 : f32 to vector<8x128xf32>
      %44 = arith.mulf %43, %42 : vector<8x128xf32>
      %cst_22 = arith.constant 5.000000e-01 : f32
      %45 = vector.broadcast %cst_22 : f32 to vector<8x128xf32>
      %46 = arith.addf %44, %45 : vector<8x128xf32>
      %47 = arith.mulf %36, %14 : vector<8x128xf32>
      %48 = arith.mulf %28, %38 : vector<8x128xf32>
      %49 = arith.addf %47, %48 : vector<8x128xf32>
      %50 = math.tanh %49 : vector<8x128xf32>
      %51 = arith.mulf %46, %50 : vector<8x128xf32>
      %c0_23 = arith.constant 0 : index
      %c0_24 = arith.constant 0 : index
      %52 = vector.load %arg8[%c0_23, %c0_24] : memref<8x128xf32, #tpu.memory_space<vmem>>, vector<8x128xf32>
      tpu.vector_store %arg8[%c0_23, %c0_24], %49 {strides = array<i32>} : memref<8x128xf32, #tpu.memory_space<vmem>>, vector<8x128xf32>,
      %53 = arith.truncf %51 : vector<8x128xf32> to vector<8x128xbf16>
      %c0_25 = arith.constant 0 : index
      %c0_26 = arith.constant 0 : index
      %54 = vector.load %arg7[%c0_25, %c0_26] : memref<8x128xbf16, #tpu.memory_space<vmem>>, vector<8x128xbf16>
      tpu.vector_store %arg7[%c0_25, %c0_26], %53 {strides = array<i32>} : memref<8x128xbf16, #tpu.memory_space<vmem>>, vector<8x128xbf16>,
      %c1_i32 = arith.constant 1 : i32
      %c0_27 = arith.constant 0 : index
      %c0_28 = arith.constant 0 : index
      %55 = vector.load %arg7[%c0_27, %c0_28] : memref<8x128xbf16, #tpu.memory_space<vmem>>, vector<8x128xbf16>
      %c0_29 = arith.constant 0 : index
      %c0_30 = arith.constant 0 : index
      %56 = vector.load %arg8[%c0_29, %c0_30] : memref<8x128xf32, #tpu.memory_space<vmem>>, vector<8x128xf32>
      %57 = arith.index_cast %c1_i32 : i32 to index
      %c0_31 = arith.constant 0 : index
      %c0_32 = arith.constant 0 : index
      %58 = vector.load %arg1[%57, %c0_31, %c0_32] : memref<3x8x512xbf16, #tpu.memory_space<vmem>>, vector<1x8x512xbf16>
      %59 = vector.shape_cast %58 : vector<1x8x512xbf16> to vector<8x512xbf16>
      %60 = arith.extf %59 : vector<8x512xbf16> to vector<8x512xf32>
      %cst_33 = arith.constant dense<0.000000e+00> : vector<8x512xf32>
      %61 = tpu.matmul %55, %3, %cst_33 {dimension_numbers = #tpu.dot_dimension_numbers<[1], [0], [0], [1], [0, 0, 1, 1], [], []>} : vector<8x128xbf16>, vector<128x512xbf16>, vector<8x512xf32> -> vector<8x512xf32>
      %62 = arith.addf %60, %61 : vector<8x512xf32>
      %63 = vector.extract_strided_slice %62 {offsets = [0, 0], sizes = [8, 128], strides = [1, 1]} : vector<8x512xf32> to vector<8x128xf32>
      %cst_34 = arith.constant 5.000000e-01 : f32
      %64 = vector.broadcast %cst_34 : f32 to vector<8x128xf32>
      %65 = arith.mulf %64, %63 : vector<8x128xf32>
      %66 = math.tanh %65 : vector<8x128xf32>
      %cst_35 = arith.constant 5.000000e-01 : f32
      %67 = vector.broadcast %cst_35 : f32 to vector<8x128xf32>
      %68 = arith.mulf %67, %66 : vector<8x128xf32>
      %cst_36 = arith.constant 5.000000e-01 : f32
      %69 = vector.broadcast %cst_36 : f32 to vector<8x128xf32>
      %70 = arith.addf %68, %69 : vector<8x128xf32>
      %71 = vector.extract_strided_slice %62 {offsets = [0, 128], sizes = [8, 128], strides = [1, 1]} : vector<8x512xf32> to vector<8x128xf32>
      %cst_37 = arith.constant 5.000000e-01 : f32
      %72 = vector.broadcast %cst_37 : f32 to vector<8x128xf32>
      %73 = arith.mulf %72, %71 : vector<8x128xf32>
      %74 = math.tanh %73 : vector<8x128xf32>
      %cst_38 = arith.constant 5.000000e-01 : f32
      %75 = vector.broadcast %cst_38 : f32 to vector<8x128xf32>
      %76 = arith.mulf %75, %74 : vector<8x128xf32>
      %cst_39 = arith.constant 5.000000e-01 : f32
      %77 = vector.broadcast %cst_39 : f32 to vector<8x128xf32>
      %78 = arith.addf %76, %77 : vector<8x128xf32>
      %79 = vector.extract_strided_slice %62 {offsets = [0, 256], sizes = [8, 128], strides = [1, 1]} : vector<8x512xf32> to vector<8x128xf32>
      %80 = math.tanh %79 : vector<8x128xf32>
      %81 = vector.extract_strided_slice %62 {offsets = [0, 384], sizes = [8, 128], strides = [1, 1]} : vector<8x512xf32> to vector<8x128xf32>
      %cst_40 = arith.constant 5.000000e-01 : f32
      %82 = vector.broadcast %cst_40 : f32 to vector<8x128xf32>
      %83 = arith.mulf %82, %81 : vector<8x128xf32>
      %84 = math.tanh %83 : vector<8x128xf32>
      %cst_41 = arith.constant 5.000000e-01 : f32
      %85 = vector.broadcast %cst_41 : f32 to vector<8x128xf32>
      %86 = arith.mulf %85, %84 : vector<8x128xf32>
      %cst_42 = arith.constant 5.000000e-01 : f32
      %87 = vector.broadcast %cst_42 : f32 to vector<8x128xf32>
      %88 = arith.addf %86, %87 : vector<8x128xf32>
      %89 = arith.mulf %78, %56 : vector<8x128xf32>
      %90 = arith.mulf %70, %80 : vector<8x128xf32>
      %91 = arith.addf %89, %90 : vector<8x128xf32>
      %92 = math.tanh %91 : vector<8x128xf32>
      %93 = arith.mulf %88, %92 : vector<8x128xf32>
      %c0_43 = arith.constant 0 : index
      %c0_44 = arith.constant 0 : index
      %94 = vector.load %arg8[%c0_43, %c0_44] : memref<8x128xf32, #tpu.memory_space<vmem>>, vector<8x128xf32>
      tpu.vector_store %arg8[%c0_43, %c0_44], %91 {strides = array<i32>} : memref<8x128xf32, #tpu.memory_space<vmem>>, vector<8x128xf32>,
      %95 = arith.truncf %93 : vector<8x128xf32> to vector<8x128xbf16>
      %c0_45 = arith.constant 0 : index
      %c0_46 = arith.constant 0 : index
      %96 = vector.load %arg7[%c0_45, %c0_46] : memref<8x128xbf16, #tpu.memory_space<vmem>>, vector<8x128xbf16>
      tpu.vector_store %arg7[%c0_45, %c0_46], %95 {strides = array<i32>} : memref<8x128xbf16, #tpu.memory_space<vmem>>, vector<8x128xbf16>,
      %c2_i32_47 = arith.constant 2 : i32
    } else {
    }
    %c2_i32_5 = arith.constant 2 : i32
    %10 = arith.cmpi eq, %arg0, %c2_i32_5 : i32
    %11 = arith.extui %10 : i1 to i32
    %c0_i32_6 = arith.constant 0 : i32
    %12 = arith.cmpi ne, %11, %c0_i32_6 : i32
    scf.if %12 {
      %c0_7 = arith.constant 0 : index
      %c0_8 = arith.constant 0 : index
      %13 = vector.load %arg7[%c0_7, %c0_8] : memref<8x128xbf16, #tpu.memory_space<vmem>>, vector<8x128xbf16>
      %14 = arith.extf %13 : vector<8x128xbf16> to vector<8x128xf32>
      %c0_9 = arith.constant 0 : index
      %c0_10 = arith.constant 0 : index
      %15 = vector.load %arg3[%c0_9, %c0_10] : memref<8x1xf32, #tpu.memory_space<vmem>>, vector<8x1xf32>
      %16 = vector.broadcast %15 : vector<8x1xf32> to vector<8x128xf32>
      %17 = arith.mulf %14, %16 : vector<8x128xf32>
      %18 = arith.truncf %17 : vector<8x128xf32> to vector<8x128xbf16>
      %c0_11 = arith.constant 0 : index
      %c0_12 = arith.constant 0 : index
      %19 = vector.load %arg4[%c0_11, %c0_12] : memref<128x512xbf16, #tpu.memory_space<vmem>>, vector<128x512xbf16>
      %cst = arith.constant dense<0.000000e+00> : vector<8x512xf32>
      %20 = tpu.matmul %18, %19, %cst {dimension_numbers = #tpu.dot_dimension_numbers<[1], [0], [0], [1], [0, 0, 1, 1], [], []>} : vector<8x128xbf16>, vector<128x512xbf16>, vector<8x512xf32> -> vector<8x512xf32>
      %c0_13 = arith.constant 0 : index
      %c0_14 = arith.constant 0 : index
      %21 = vector.load %arg5[%c0_13, %c0_14] : memref<1x512xf32, #tpu.memory_space<vmem>>, vector<1x512xf32>
      %22 = vector.broadcast %21 : vector<1x512xf32> to vector<8x512xf32>
      %23 = arith.addf %20, %22 : vector<8x512xf32>
      %c0_15 = arith.constant 0 : index
      %c0_16 = arith.constant 0 : index
      %24 = vector.load %arg6[%c0_15, %c0_16] : memref<8x512xf32, #tpu.memory_space<vmem>>, vector<8x512xf32>
      tpu.vector_store %arg6[%c0_15, %c0_16], %23 {strides = array<i32>} : memref<8x512xf32, #tpu.memory_space<vmem>>, vector<8x512xf32>,
    } else {
    }
    return
  }
  func.func @transform_0(%arg0: i32) -> (i32, i32, i32) {
    %c0_i32 = arith.constant 0 : i32
    %c0_i32_0 = arith.constant 0 : i32
    %c0_i32_1 = arith.constant 0 : i32
    return %arg0, %c0_i32, %c0_i32_0 : i32, i32, i32
  }
  func.func @transform_1(%arg0: i32) -> (i32, i32) {
    %c0_i32 = arith.constant 0 : i32
    %c0_i32_0 = arith.constant 0 : i32
    %c0_i32_1 = arith.constant 0 : i32
    return %c0_i32, %c0_i32_0 : i32, i32
  }
  func.func @transform_2(%arg0: i32) -> (i32, i32) {
    %c0_i32 = arith.constant 0 : i32
    %c0_i32_0 = arith.constant 0 : i32
    %c0_i32_1 = arith.constant 0 : i32
    return %c0_i32, %c0_i32_0 : i32, i32
  }
  func.func @transform_3(%arg0: i32) -> (i32, i32) {
    %c0_i32 = arith.constant 0 : i32
    %c0_i32_0 = arith.constant 0 : i32
    %c0_i32_1 = arith.constant 0 : i32
    return %c0_i32, %c0_i32_0 : i32, i32
  }
  func.func @transform_4(%arg0: i32) -> (i32, i32) {
    %c0_i32 = arith.constant 0 : i32
    %c0_i32_0 = arith.constant 0 : i32
    %c0_i32_1 = arith.constant 0 : i32
    return %c0_i32, %c0_i32_0 : i32, i32
  }
  func.func @transform_5(%arg0: i32) -> (i32, i32) {
    %c0_i32 = arith.constant 0 : i32
    %c0_i32_0 = arith.constant 0 : i32
    %c0_i32_1 = arith.constant 0 : i32
    return %c0_i32, %c0_i32_0 : i32, i32
  }
}

</mosaic_0001>

<bundles_post_ra>
// kernel: tpu_custom_call.1
= control target key start
LH: loop header
LB: loop body
LE: loop exit
PB: predicated region body
PF: predicated region fallthrough
CT: control target
= control target key end

     0   :  { %10 = vsyncpa [#allocation5], 0  ;;  %s2666_s0 = inlined_call_operand.hbm [shape: bf16[9,8,512], index: 0, kind: input, shape index: {}]   ;;  %s2667_s1 = inlined_call_operand.hbm [shape: bf16[128,512], index: 1, kind: input, shape index: {}]   ;;  %s2668_s2 = inlined_call_operand.vmem [shape: f32[8,1], index: 2, kind: input, shape index: {}]   ;;  %s2669_s3 = inlined_call_operand.hbm [shape: bf16[128,512], index: 3, kind: input, shape index: {}]   ;;  %s2670_s4 = inlined_call_operand.vmem [shape: f32[1,512], index: 4, kind: input, shape index: {}]   ;;  %s2671_s5 = inlined_call_operand.hbm [shape: f32[8,512], index: 5, kind: output, shape index: {}]  }
   0x1   :  { %12 = vsyncpa [#allocation5 + $0x1], 0 }
   0x2   :  { %13 = vsyncpa [#allocation8], 0 }
   0x3   :  { %14 = vsyncpa [#allocation6], 0  ;;  %s2077_s18 = smov 0   ;;  %s2079_s19 = smov 0  }
   0x4   :  { %s2081_s20 = smov 0   ;;  %s2083_s21 = smov 0  }
   0x5 LB: > { %s2096_s22 = sadd.s32 4294967295, %s2035_s21   ;;  %p40_p0 = scmp.ne.s32.totalorder %s2027_s19, %s2023_s18  ;;  %s2035_s21 = sphi %s2083_s21, %s2778_s21   ;;  %s2031_s20 = sphi %s2081_s20, %s2777_s20   ;;  %s2027_s19 = sphi %s2079_s19, %s2776_s19   ;;  %s2023_s18 = sphi %s2077_s18, %s2775_s18  }
   0x6   : > { %p2672_p1 = scmp.eq.s32.totalorder %s2096_s22, 0  ;;  %p1594_p2 = scmp.ge.s32.totalorder %s2035_s21, 1 }
   0x7   : > { %p156_p3 = scmp.lt.s32.totalorder %s2035_s21, 4  ;;  %s2037_s25 = smov [#allocation7]  }
   0x8   : > { %p2105_p5 = por %p2672_p1, %p40_p0  ;;  %s168_s26 = sshll.u32 %s2037_s25, 4  ;;  %s169_s26 = int_to_ptr.vmem [resolvable:$true] %s168_s26 }
   0x9   : > { %p2109_p6 = pnand %p1594_p2, %p156_p3  ;;  %s2038_s28 = smov [#allocation9]  }
   0xa   : > { %s2721_s23 = scalar_select %p2105_p5, 1, 0 }
   0xb   : > { %s2722_s24 = scalar_select %p2109_p6, 1, 0 }
   0xc   : > { %p1731_p7 = pneg %p2109_p6  ;;  %s184_s29 = sshll.u32 %s2038_s28, 4  ;;  %s185_s29 = int_to_ptr.vmem [resolvable:$true] %s184_s29 }
   0xd   : > { %s1900_s30 = scalar_lea.vmem %s169_s26, 4096  ;;  %p1908_p13 = scmp.lt.s32.totalorder %s169_s26, %s169_s26 }
   0xe   : > { %p2117_p8 = pnand %p1731_p7, %p2672_p1  ;;  %p1901_p10 = scmp.ne.s32.totalorder %s169_s26, %s1900_s30 }
   0xf   : > { %p1909_p0 = scmp.lt.s32.totalorder %s1900_s30, %s1900_s30 }
  0x10   : > { %p1891_p9 = pneg %p2117_p8 }
  0x11   : > { %p1910_p2 = por %p1909_p0, %p1908_p13 }
  0x12   : > { %p1903_p11 = pnand %p1901_p10, %p1891_p9 }
  0x14   : > { %p1904_p12 = pneg %p1903_p11 }
  0x16   : > { %p1911_p3 = pnand %p1910_p2, %p1904_p12 }
  0x18   : > { %1914 = shalt.err (!%p1911_p3)
}
  0x19   : > { %s2039_s6 = smov 256   ;;  %s2040_s7 = smov 16  }
  0x1a   : > { %1734 = dma.hbm_to_vmem [thread:$0]  (!%p2117_p8), %s2667_s1, 4096, %s169_s26, [#allocation8], %s2039_s6, %s2039_s6, %s2040_s7  }
  0x1b   : > { %s1926_s10 = scalar_lea.vmem %s185_s29, 4096  ;;  %p1934_p12 = scmp.lt.s32.totalorder %s185_s29, %s185_s29 }
  0x1c   : > { %p1927_p7 = scmp.ne.s32.totalorder %s185_s29, %s1926_s10  ;;  %p1935_p13 = scmp.lt.s32.totalorder %s1926_s10, %s1926_s10 }
  0x1e   : > { %p1929_p10 = pnand %p1927_p7, %p1891_p9  ;;  %p1936_p0 = por %p1935_p13, %p1934_p12 }
  0x20   : > { %p1930_p11 = pneg %p1929_p10 }
  0x22   : > { %p1937_p2 = pnand %p1936_p0, %p1930_p11 }
  0x24   : > { %1940 = shalt.err (!%p1937_p2)
}
  0x25   : > { %1737 = dma.hbm_to_vmem [thread:$0]  (!%p2117_p8), %s2669_s3, 4096, %s185_s29, [#allocation8], %s2039_s6, %s2039_s6, %s2040_s7  }
  0x26   : > { %s2146_s13 = sadd.s32 1, %s2035_s21   ;;  %s27_s14 = sadd.s32 1, %s2031_s20 }
  0x27   : > { %s24_s15 = ssub.s32 %s2035_s21, %s2146_s13  ;;  %p34_p9 = scmp.ne.s32.totalorder %s2031_s20, %s2027_s19 }
  0x28   : > { %p25_p3 = scmp.eq.s32.totalorder %s24_s15, 0  ;;  %p35_p7 = scmp.eq.s32.totalorder %s2035_s21, 0 }
  0x29   : > { %p1744_p10 = scmp.lt.s32.totalorder %s2035_s21, 3  ;;  %s201_s16 = sand.u32 1, %s2031_s20  }
  0x2a   : > { %s2157_s17 = scalar_select %p25_p3, %s2031_s20, %s27_s14  }
  0x2b   : > { %p36_p11 = por %p35_p7, %p34_p9  ;;  %s1715_s18 = smul.u32 48, %s201_s16 }
  0x2c   : > { %s1714_s25 = smul.u32 768, %s2035_s21  ;;  %s2171_s9 = scalar_lea.sflag [#allocation5], %s201_s16 }
  0x2d   : > { %p2160_p12 = pnand %p1744_p10, %p36_p11  ;;  %s205_s30 = scalar_lea.vmem [#allocation4], %s1715_s18 }
  0x2e   : > { %s2167_s29 = scalar_lea.hbm %s2666_s0, %s1714_s25  ;;  %s213_s8 = sshll.u32 %s205_s30, 4  ;;  %s2169_s8 = int_to_ptr.vmem [resolvable:$true] %s213_s8 }
  0x2f   : > { %s1941_s21 = scalar_lea.hbm %s2167_s29, 768  ;;  %p1943_p13 = pneg %p2160_p12 }
  0x30   : > { %p1942_p8 = scmp.ne.s32.totalorder %s2167_s29, %s1941_s21  ;;  %s1946_s12 = scalar_lea.hbm %s2666_s0, 2304 }
  0x31   : > { %p1947_p9 = scmp.lt.s32.totalorder %s2167_s29, %s2666_s0  ;;  %p1948_p3 = scmp.lt.s32.totalorder %s1946_s12, %s1941_s21 }
  0x32   : > { %p1944_p0 = pnand %p1943_p13, %p1942_p8 }
  0x33   : > { %p1949_p7 = por %p1948_p3, %p1947_p9 }
  0x34   : > { %p1945_p2 = pneg %p1944_p0 }
  0x36   : > { %p1950_p10 = pnand %p1949_p7, %p1945_p2 }
  0x38   : > { %1953 = shalt.err (!%p1950_p10)
}
  0x39   : > { %s1954_s16 = scalar_lea.vmem %s2169_s8, 768  ;;  %s2041_s18 = smov [#allocation4]  }
  0x3a   : > { %p1955_p11 = scmp.ne.s32.totalorder %s2169_s8, %s1954_s16  ;;  %s1959_s25 = sshll.u32 %s2041_s18, 4  ;;  %s1960_s25 = int_to_ptr.vmem [resolvable:$false] %s1959_s25 }
  0x3b   : > { %s1961_s27 = scalar_lea.vmem %s1960_s25, 1536  ;;  %p1962_p0 = scmp.lt.s32.totalorder %s2169_s8, %s1960_s25 }
  0x3c   : > { %p1957_p4 = pnand %p1955_p11, %p1943_p13  ;;  %p1963_p1 = scmp.lt.s32.totalorder %s1961_s27, %s1954_s16 }
  0x3e   : > { %p1958_p8 = pneg %p1957_p4  ;;  %p1964_p5 = por %p1963_p1, %p1962_p0 }
  0x40   : > { %p1965_p6 = pnand %p1964_p5, %p1958_p8 }
  0x42   : > { %1968 = shalt.err (!%p1965_p6)
}
  0x43   : > { %1741 = dma.hbm_to_vmem [thread:$0]  (!%p2160_p12), %s2167_s29, 768, %s2169_s8, %s2171_s9, %s2039_s6, %s2039_s6, %s2040_s7  }
  0x44   : > { %p2725_p4 = scmp.ne.s32.totalorder %s2722_s24, 0 }
  0x46   : > { %225 = sbr.rel (%p2725_p4) target bundleno = 1629 (0x65d), region = 40 }
  0x4b   : > { %s227_s28 = sand.u32 1, %s2027_s19   ;;  %p2726_p1 = scmp.ne.s32.totalorder %s2721_s23, 0 }
  0x4c   : > { %s1716_s30 = smul.u32 48, %s227_s28  ;;  %s228_s21 = scalar_lea.sflag [#allocation5], %s227_s28 }
  0x4e   : > { %s2198_s10 = scalar_lea.vmem [#allocation4], %s1716_s30 }
  0x4f   : > { %2010 = dma.done.wait (%p2726_p1), %s228_s21, 768  }
  0x50   : > { %2012 = vsyncadd (%p2726_p1), %s228_s21, 4294966528  ;;  %p2727_p5 = scmp.eq.s32.totalorder %s2096_s22, 0 }
  0x52   : > { %2014 = dma.done.wait (%p2727_p5), [#allocation8], 8192   ;;  %p2728_p6 = pmov %p2727_p5 }
  0x53   : > { %p2729_p12 = scmp.ne.s32.totalorder %s2096_s22, 0 }
  0x54   : > { %2016 = vsyncadd (%p2728_p6), [#allocation8], 4294959104 }
  0x55   : > { %266 = sbr.rel (%p2729_p12) target bundleno = 92 (0x5c), region = 56 }
  0x5a   : > { %v2042_v0 = vmov 0   ;;  %v2043_v1 = vmov 0.0  }
  0x5b   : > { %267 = vst [vmem:[#allocation2] sm:$0xf] %v2042_v0  ;;  %268 = vst [vmem:[#allocation3] sm:$0xff] %v2043_v1 }
  0x5c PF: > { %v2210_v2 = vld [vmem:[#allocation7] sm:$0xff]  ;;  %v2212_v3 = vld [vmem:[#allocation7 + $0x8] sm:$0xff]  ;;  %v2214_v4 = vld [vmem:[#allocation7 + $0x10] sm:$0xff]  ;;  %p1604_p13 = scmp.ge.s32.totalorder %s2096_s22, 2 }
  0x5d   : > { %2730 = vst [vmem:[#allocation14_spill] sm:$0xff] %v2210_v2  ;;  %2731 = vst [vmem:[#allocation15_spill] sm:$0xff] %v2212_v3  ;;  %v2216_v5 = vld [vmem:[#allocation7 + $0x18] sm:$0xff]  ;;  %v2218_v6 = vld [vmem:[#allocation7 + $0x20] sm:$0xff] }
  0x5e   : > { %2732 = vst [vmem:[#allocation16_spill] sm:$0xff] %v2214_v4  ;;  %2733 = vst [vmem:[#allocation17_spill] sm:$0xff] %v2216_v5  ;;  %v2220_v7 = vld [vmem:[#allocation7 + $0x28] sm:$0xff]  ;;  %v2222_v8 = vld [vmem:[#allocation7 + $0x30] sm:$0xff] }
  0x5f   : > { %2734 = vst [vmem:[#allocation18_spill] sm:$0xff] %v2218_v6  ;;  %2735 = vst [vmem:[#allocation19_spill] sm:$0xff] %v2220_v7  ;;  %v2224_v9 = vld [vmem:[#allocation7 + $0x38] sm:$0xff]  ;;  %v2226_v10 = vld [vmem:[#allocation7 + $0x40] sm:$0xff] }
  0x60   : > { %2736 = vst [vmem:[#allocation20_spill] sm:$0xff] %v2222_v8  ;;  %2737 = vst [vmem:[#allocation21_spill] sm:$0xff] %v2224_v9  ;;  %v2228_v11 = vld [vmem:[#allocation7 + $0x48] sm:$0xff]  ;;  %v2230_v12 = vld [vmem:[#allocation7 + $0x50] sm:$0xff] }
  0x61   : > { %2738 = vst [vmem:[#allocation22_spill] sm:$0xff] %v2226_v10  ;;  %2739 = vst [vmem:[#allocation23_spill] sm:$0xff] %v2228_v11  ;;  %v2232_v13 = vld [vmem:[#allocation7 + $0x58] sm:$0xff]  ;;  %v2234_v14 = vld [vmem:[#allocation7 + $0x60] sm:$0xff] }
  0x62   : > { %2740 = vst [vmem:[#allocation24_spill] sm:$0xff] %v2230_v12  ;;  %2741 = vst [vmem:[#allocation25_spill] sm:$0xff] %v2232_v13  ;;  %v2236_v15 = vld [vmem:[#allocation7 + $0x68] sm:$0xff]  ;;  %v2238_v16 = vld [vmem:[#allocation7 + $0x70] sm:$0xff] }
  0x63   : > { %2742 = vst [vmem:[#allocation26_spill] sm:$0xff] %v2234_v14  ;;  %2743 = vst [vmem:[#allocation27_spill] sm:$0xff] %v2236_v15  ;;  %v2240_v17 = vld [vmem:[#allocation7 + $0x78] sm:$0xff]  ;;  %v2242_v18 = vld [vmem:[#allocation7 + $0x80] sm:$0xff] }
  0x64   : > { %2744 = vst [vmem:[#allocation28_spill] sm:$0xff] %v2238_v16  ;;  %2745 = vst [vmem:[#allocation29_spill] sm:$0xff] %v2240_v17  ;;  %v2244_v19 = vld [vmem:[#allocation7 + $0x88] sm:$0xff]  ;;  %v2246_v20 = vld [vmem:[#allocation7 + $0x90] sm:$0xff] }
  0x65   : > { %2746 = vst [vmem:[#allocation30_spill] sm:$0xff] %v2242_v18  ;;  %2747 = vst [vmem:[#allocation31_spill] sm:$0xff] %v2244_v19  ;;  %v2248_v21 = vld [vmem:[#allocation7 + $0x98] sm:$0xff]  ;;  %v2250_v22 = vld [vmem:[#allocation7 + $0xa0] sm:$0xff]  ;;  %304 = sbr.rel (%p1604_p13) target bundleno = 874 (0x36a), region = 60 }
  0x66   : > { %2748 = vst [vmem:[#allocation32_spill] sm:$0xff] %v2246_v20  ;;  %2749 = vst [vmem:[#allocation33_spill] sm:$0xff] %v2248_v21  ;;  %v2252_v23 = vld [vmem:[#allocation7 + $0xa8] sm:$0xff]  ;;  %v2254_v24 = vld [vmem:[#allocation7 + $0xb0] sm:$0xff] }
  0x67   : > { %2750 = vst [vmem:[#allocation34_spill] sm:$0xff] %v2252_v23  ;;  %v2256_v25 = vld [vmem:[#allocation7 + $0xb8] sm:$0xff]  ;;  %v2258_v26 = vld [vmem:[#allocation7 + $0xc0] sm:$0xff]  ;;  %v2260_v27 = vld [vmem:[#allocation7 + $0xc8] sm:$0xff] }
  0x68   : > { %2751 = vst [vmem:[#allocation35_spill] sm:$0xff] %v2256_v25  ;;  %v2262_v28 = vld [vmem:[#allocation7 + $0xd0] sm:$0xff]  ;;  %v2264_v29 = vld [vmem:[#allocation7 + $0xd8] sm:$0xff]  ;;  %v2266_v30 = vld [vmem:[#allocation7 + $0xe0] sm:$0xff] }
  0x69   : > { %v2268_v31 = vld [vmem:[#allocation7 + $0xe8] sm:$0xff]  ;;  %v2270_v32 = vld [vmem:[#allocation7 + $0xf0] sm:$0xff]  ;;  %v2272_v33 = vld [vmem:[#allocation7 + $0xf8] sm:$0xff] }
  0x6a   : > { %v2277_v34 = vcombine.high %v2266_v30, %v2270_v32  ;;  %v2281_v35 = vcombine.low %v2266_v30, %v2270_v32  ;;  %v2285_v36 = vcombine.high %v2268_v31, %v2272_v33  ;;  %v2289_v37 = vcombine.low %v2268_v31, %v2272_v33 }
  0x6b   : > { %v2293_v38 = vcombine.high %v2258_v26, %v2262_v28  ;;  %v2297_v39 = vcombine.high %v2260_v27, %v2264_v29  ;;  %v2305_v40 = vcombine.low %v2258_v26, %v2262_v28  ;;  %v2309_v41 = vcombine.low %v2260_v27, %v2264_v29 }
  0x6c   : > { %473 = vmatprep.subr.bf16.mxu0 %v2277_v34  ;;  %514 = vmatprep.subr.bf16.mxu1 %v2285_v36  ;;  %v2315_v42 = vcombine.high %v2250_v22, %v2254_v24  ;;  %v2319_v43 = vcombine.high %v2252_v23, %v2256_v25  ;;  %v2675_v44 = vmov 0   ;;  %v2327_v45 = vcombine.low %v2250_v22, %v2254_v24 }
  0x6d   : > { %474 = vmatpush1.bf16.msra.mxu0 %v2281_v35  ;;  %515 = vmatpush1.bf16.msra.mxu1 %v2289_v37  ;;  %v2331_v46 = vcombine.low %v2252_v23, %v2256_v25  ;;  %v2337_v47 = vcombine.high %v2242_v18, %v2246_v20  ;;  %v2341_v48 = vcombine.high %v2244_v19, %v2248_v21 }
  0x6e   : > { %475 = vmatprep.subr.bf16.mxu0 %v2293_v38  ;;  %516 = vmatprep.subr.bf16.mxu1 %v2297_v39  ;;  %v2347_v49 = vcombine.low %v2242_v18, %v2246_v20  ;;  %v2351_v50 = vcombine.low %v2244_v19, %v2248_v21  ;;  %v2357_v51 = vcombine.high %v2234_v14, %v2238_v16 }
  0x6f   : > { %505 = vmatprep.mubr.bf16.mxu0 %v2675_v44  ;;  %546 = vmatprep.mubr.bf16.mxu1 %v2675_v44  ;;  %v2361_v52 = vcombine.high %v2236_v15, %v2240_v17  ;;  %v2367_v53 = vcombine.low %v2234_v14, %v2238_v16  ;;  %v2371_v54 = vcombine.low %v2236_v15, %v2240_v17 }
  0x70   : > { %v2377_v55 = vcombine.high %v2226_v10, %v2230_v12  ;;  %v2381_v56 = vcombine.high %v2228_v11, %v2232_v13  ;;  %v2387_v57 = vcombine.low %v2226_v10, %v2230_v12  ;;  %v2391_v58 = vcombine.low %v2228_v11, %v2232_v13 }
  0x71   : > { %476 = vmatpush1.bf16.msra.mxu0 %v2305_v40  ;;  %517 = vmatpush1.bf16.msra.mxu1 %v2309_v41  ;;  %v2397_v59 = vcombine.high %v2218_v6, %v2222_v8  ;;  %v2401_v60 = vcombine.high %v2220_v7, %v2224_v9  ;;  %v2407_v61 = vcombine.low %v2218_v6, %v2222_v8 }
  0x72   : > { %477 = vmatprep.subr.bf16.mxu0 %v2315_v42  ;;  %518 = vmatprep.subr.bf16.mxu1 %v2319_v43  ;;  %v2411_v62 = vcombine.low %v2220_v7, %v2224_v9  ;;  %v2417_v63 = vcombine.high %v2210_v2, %v2214_v4  ;;  %v2421_v0 = vcombine.high %v2212_v3, %v2216_v5  ;;  %v305_v7 = vld [vmem:[#allocation2] sm:$0xf] }
  0x73   : > { %v2427_v1 = vcombine.low %v2210_v2, %v2214_v4  ;;  %v2431_v44 = vcombine.low %v2212_v3, %v2216_v5  ;;  %v2752_v3 = vmov 0   ;;  %v308_v2 = vld [vmem:[%s2198_s10 + $0x8] sm:$0xff] }
  0x74   : > { %v311_v11 = vunpack.c.l.bf16 %v308_v2 }
  0x75   : > { %478 = vmatpush1.bf16.msra.mxu0 %v2327_v45  ;;  %519 = vmatpush1.bf16.msra.mxu1 %v2331_v46 }
  0x76   : > { %479 = vmatprep.subr.bf16.mxu0 %v2337_v47  ;;  %520 = vmatprep.subr.bf16.mxu1 %v2341_v48 }
  0x79   : > { %480 = vmatpush1.bf16.msra.mxu0 %v2347_v49  ;;  %521 = vmatpush1.bf16.msra.mxu1 %v2351_v50 }
  0x7a   : > { %481 = vmatprep.subr.bf16.mxu0 %v2357_v51  ;;  %522 = vmatprep.subr.bf16.mxu1 %v2361_v52 }
  0x7d   : > { %482 = vmatpush1.bf16.msra.mxu0 %v2367_v53  ;;  %523 = vmatpush1.bf16.msra.mxu1 %v2371_v54 }
  0x7e   : > { %483 = vmatprep.subr.bf16.mxu0 %v2377_v55  ;;  %524 = vmatprep.subr.bf16.mxu1 %v2381_v56 }
  0x81   : > { %484 = vmatpush1.bf16.msra.mxu0 %v2387_v57  ;;  %525 = vmatpush1.bf16.msra.mxu1 %v2391_v58 }
  0x82   : > { %485 = vmatprep.subr.bf16.mxu0 %v2397_v59  ;;  %526 = vmatprep.subr.bf16.mxu1 %v2401_v60 }
  0x85   : > { %486 = vmatpush1.bf16.msra.mxu0 %v2407_v61  ;;  %527 = vmatpush1.bf16.msra.mxu1 %v2411_v62 }
  0x86   : > { %487 = vmatprep.subr.bf16.mxu0 %v2417_v63  ;;  %528 = vmatprep.subr.bf16.mxu1 %v2421_v0 }
  0x89   : > { %488 = vmatpush1.bf16.msra.mxu0 %v2427_v1  ;;  %529 = vmatpush1.bf16.msra.mxu1 %v2431_v44 }
  0x8a   : > { %589 = vmatprep.subr.bf16.mxu0 %v2277_v34  ;;  %630 = vmatprep.subr.bf16.mxu1 %v2285_v36 }
  0x8c   : > { %506 = vmatmul.mubr.bf16.vlgmr.msra.gmra.mxu0 %v305_v7  ;;  %547 = vmatmul.mubr.bf16.vlgmr.msra.gmra.mxu1 %v305_v7  ;;  %v307_v7 = vld [vmem:[%s2198_s10] sm:$0xff] }
  0x8d   : > { %590 = vmatpush1.bf16.msra.mxu0 %v2281_v35  ;;  %631 = vmatpush1.bf16.msra.mxu1 %v2289_v37  ;;  %v309_v5 = vunpack.c.l.bf16 %v307_v7  ;;  %v310_v4 = vunpack.c.h.bf16 %v307_v7 }
  0x8e   : > { %591 = vmatprep.subr.bf16.mxu0 %v2293_v38  ;;  %632 = vmatprep.subr.bf16.mxu1 %v2297_v39 }
  0x8f   : > { %621 = vmatprep.mubr.bf16.mxu0 %v2752_v3  ;;  %662 = vmatprep.mubr.bf16.mxu1 %v2752_v3 }
  0x91   : > { %592 = vmatpush1.bf16.msra.mxu0 %v2305_v40  ;;  %633 = vmatpush1.bf16.msra.mxu1 %v2309_v41 }
  0x92   : > { %593 = vmatprep.subr.bf16.mxu0 %v2315_v42  ;;  %634 = vmatprep.subr.bf16.mxu1 %v2319_v43 }
  0x95   : > { %594 = vmatpush1.bf16.msra.mxu0 %v2327_v45  ;;  %635 = vmatpush1.bf16.msra.mxu1 %v2331_v46 }
  0x96   : > { %595 = vmatprep.subr.bf16.mxu0 %v2337_v47  ;;  %636 = vmatprep.subr.bf16.mxu1 %v2341_v48 }
  0x99   : > { %596 = vmatpush1.bf16.msra.mxu0 %v2347_v49  ;;  %637 = vmatpush1.bf16.msra.mxu1 %v2351_v50 }
  0x9a   : > { %597 = vmatprep.subr.bf16.mxu0 %v2357_v51  ;;  %638 = vmatprep.subr.bf16.mxu1 %v2361_v52 }
  0x9d   : > { %598 = vmatpush1.bf16.msra.mxu0 %v2367_v53  ;;  %639 = vmatpush1.bf16.msra.mxu1 %v2371_v54 }
  0x9e   : > { %599 = vmatprep.subr.bf16.mxu0 %v2377_v55  ;;  %640 = vmatprep.subr.bf16.mxu1 %v2381_v56 }
  0xa1   : > { %600 = vmatpush1.bf16.msra.mxu0 %v2387_v57  ;;  %641 = vmatpush1.bf16.msra.mxu1 %v2391_v58 }
  0xa2   : > { %601 = vmatprep.subr.bf16.mxu0 %v2397_v59  ;;  %642 = vmatprep.subr.bf16.mxu1 %v2401_v60 }
  0xa5   : > { %602 = vmatpush1.bf16.msra.mxu0 %v2407_v61  ;;  %643 = vmatpush1.bf16.msra.mxu1 %v2411_v62 }
  0xa6   : > { %603 = vmatprep.subr.bf16.mxu0 %v2417_v63  ;;  %644 = vmatprep.subr.bf16.mxu1 %v2421_v0 }
  0xa9   : > { %604 = vmatpush1.bf16.msra.mxu0 %v2427_v1  ;;  %645 = vmatpush1.bf16.msra.mxu1 %v2431_v44 }
  0xaa   : > { %705 = vmatprep.subr.bf16.mxu0 %v2277_v34  ;;  %746 = vmatprep.subr.bf16.mxu1 %v2285_v36  ;;  %v312_v36 = vunpack.c.h.bf16 %v308_v2 }
 0x14c   : > { %v507_v9 = vpop.f32.mrf.mxu0  ;;  %v548_v6 = vpop.f32.mrf.mxu1 }
 0x14d   : > { %v555_v8 = vadd.f32 %v507_v9, %v309_v5  ;;  %v557_v19 = vadd.f32 %v548_v6, %v311_v11 }
 0x14e   : > { %v509_v13 = vpop.f32.mrf.mxu0  ;;  %v550_v10 = vpop.f32.mrf.mxu1 }
 0x14f   : > { %v559_v12 = vmul.f32 0.5, %v555_v8  ;;  %v556_v15 = vadd.f32 %v509_v13, %v310_v4  ;;  %v558_v18 = vadd.f32 %v550_v10, %v312_v36  ;;  %v306_v4 = vld [vmem:[#allocation3] sm:$0xff] }
 0x150   : > { %v511_v17 = vpop.f32.mrf.mxu0  ;;  %v552_v14 = vpop.f32.mrf.mxu1 }
 0x151   : > { %1790 = vtanh.f32 %v559_v12  ;;  %v563_v16 = vmul.f32 0.5, %v556_v15  ;;  %v568_v7 = vmul.f32 0.5, %v558_v18 }
 0x152   : > { %v512_v34 = vpop.f32.mrf.mxu0  ;;  %v553_v21 = vpop.f32.mrf.mxu1 }
 0x153   : > { %1792 = vtanh.f32 %v563_v16 }
 0x154   : > { %1794 = vtanh.f32 %v557_v19 }
 0x155   : > { %1796 = vtanh.f32 %v568_v7  ;;  %v1639_v7 = vld [vmem:[%s2198_s10 + $0x20] sm:$0xff] }
 0x15e   : > { %v1791_v20 = vpop.eup %1790 }
 0x15f   : > { %v561_v23 = vmul.f32 0.5, %v1791_v20 }
 0x160   : > { %v1793_v5 = vpop.eup %1792 }
 0x161   : > { %v562_v9 = vadd.f32 0.5, %v561_v23  ;;  %v565_v25 = vmul.f32 0.5, %v1793_v5  ;;  %v1795_v8 = vpop.eup %1794  ;;  %v1638_v23 = vld [vmem:[%s2198_s10 + $0x18] sm:$0xff]  ;;  %v701_v5 = vunpack.c.l.bf16 %v1639_v7 }
 0x162   : > { %v1797_v6 = vpop.eup %1796 }
 0x163   : > { %v566_v13 = vadd.f32 0.5, %v565_v25  ;;  %v573_v12 = vmul.f32 %v1795_v8, %v562_v9  ;;  %v570_v11 = vmul.f32 0.5, %v1797_v6  ;;  %v702_v9 = vunpack.c.h.bf16 %v1639_v7 }
 0x165   : > { %v572_v14 = vmul.f32 %v566_v13, %v306_v4  ;;  %v571_v2 = vadd.f32 0.5, %v570_v11  ;;  %v1640_v4 = vld [vmem:[%s2198_s10 + $0x28] sm:$0xff] }
 0x166   : > { %v703_v11 = vunpack.c.l.bf16 %v1640_v4 }
 0x167   : > { %v2475_v15 = vadd.f32 %v573_v12, %v572_v14 }
 0x169   : > { %1798 = vtanh.f32 %v2475_v15 }
 0x176   : > { %v1799_v10 = vpop.eup %1798 }
 0x177   : > { %v576_v16 = vmul.f32 %v1799_v10, %v571_v2 }
 0x179   : > { %v578_v17 = vpack.c.bf16 %v576_v16, %v576_v16 }
 0x17b   : > { %579 = vst [vmem:[#allocation2] sm:$0xf] %v578_v17 }
 0x182   : > { %v580_v18 = vld [vmem:[#allocation2] sm:$0xf] }
 0x183   : > { %622 = vmatmul.mubr.bf16.vlgmr.msra.gmra.mxu0 %v580_v18  ;;  %663 = vmatmul.mubr.bf16.vlgmr.msra.gmra.mxu1 %v580_v18 }
 0x184   : > { %706 = vmatpush1.bf16.msra.mxu0 %v2281_v35  ;;  %747 = vmatpush1.bf16.msra.mxu1 %v2289_v37 }
 0x185   : > { %707 = vmatprep.subr.bf16.mxu0 %v2293_v38  ;;  %748 = vmatprep.subr.bf16.mxu1 %v2297_v39 }
 0x186   : > { %737 = vmatprep.mubr.bf16.mxu0 %v2752_v3  ;;  %778 = vmatprep.mubr.bf16.mxu1 %v2752_v3  ;;  %v1637_v3 = vld [vmem:[%s2198_s10 + $0x10] sm:$0xff] }
 0x187   : > { %v585_v19 = vunpack.c.l.bf16 %v1637_v3  ;;  %v586_v20 = vunpack.c.h.bf16 %v1637_v3 }
 0x188   : > { %708 = vmatpush1.bf16.msra.mxu0 %v2305_v40  ;;  %749 = vmatpush1.bf16.msra.mxu1 %v2309_v41  ;;  %v587_v40 = vunpack.c.l.bf16 %v1638_v23 }
 0x189   : > { %709 = vmatprep.subr.bf16.mxu0 %v2315_v42  ;;  %750 = vmatprep.subr.bf16.mxu1 %v2319_v43 }
 0x18c   : > { %710 = vmatpush1.bf16.msra.mxu0 %v2327_v45  ;;  %751 = vmatpush1.bf16.msra.mxu1 %v2331_v46 }
 0x18d   : > { %711 = vmatprep.subr.bf16.mxu0 %v2337_v47  ;;  %752 = vmatprep.subr.bf16.mxu1 %v2341_v48 }
 0x190   : > { %712 = vmatpush1.bf16.msra.mxu0 %v2347_v49  ;;  %753 = vmatpush1.bf16.msra.mxu1 %v2351_v50 }
 0x191   : > { %713 = vmatprep.subr.bf16.mxu0 %v2357_v51  ;;  %754 = vmatprep.subr.bf16.mxu1 %v2361_v52 }
 0x194   : > { %714 = vmatpush1.bf16.msra.mxu0 %v2367_v53  ;;  %755 = vmatpush1.bf16.msra.mxu1 %v2371_v54 }
 0x195   : > { %715 = vmatprep.subr.bf16.mxu0 %v2377_v55  ;;  %756 = vmatprep.subr.bf16.mxu1 %v2381_v56 }
 0x198   : > { %716 = vmatpush1.bf16.msra.mxu0 %v2387_v57  ;;  %757 = vmatpush1.bf16.msra.mxu1 %v2391_v58 }
 0x199   : > { %717 = vmatprep.subr.bf16.mxu0 %v2397_v59  ;;  %758 = vmatprep.subr.bf16.mxu1 %v2401_v60 }
 0x19c   : > { %718 = vmatpush1.bf16.msra.mxu0 %v2407_v61  ;;  %759 = vmatpush1.bf16.msra.mxu1 %v2411_v62 }
 0x19d   : > { %719 = vmatprep.subr.bf16.mxu0 %v2417_v63  ;;  %760 = vmatprep.subr.bf16.mxu1 %v2421_v0 }
 0x1a0   : > { %720 = vmatpush1.bf16.msra.mxu0 %v2427_v1  ;;  %761 = vmatpush1.bf16.msra.mxu1 %v2431_v44  ;;  %v588_v44 = vunpack.c.h.bf16 %v1638_v23 }
 0x243   : > { %v623_v21 = vpop.f32.mrf.mxu0  ;;  %v664_v25 = vpop.f32.mrf.mxu1 }
 0x244   : > { %v671_v35 = vadd.f32 %v623_v21, %v585_v19  ;;  %v673_v48 = vadd.f32 %v664_v25, %v587_v40 }
 0x245   : > { %v625_v37 = vpop.f32.mrf.mxu0  ;;  %v666_v38 = vpop.f32.mrf.mxu1 }
 0x246   : > { %v675_v39 = vmul.f32 0.5, %v671_v35  ;;  %v672_v41 = vadd.f32 %v625_v37, %v586_v20  ;;  %v674_v49 = vadd.f32 %v666_v38, %v588_v44  ;;  %v704_v20 = vunpack.c.h.bf16 %v1640_v4 }
 0x247   : > { %v627_v42 = vpop.f32.mrf.mxu0  ;;  %v668_v43 = vpop.f32.mrf.mxu1 }
 0x248   : > { %1800 = vtanh.f32 %v675_v39  ;;  %v679_v45 = vmul.f32 0.5, %v672_v41  ;;  %v684_v50 = vmul.f32 0.5, %v674_v49 }
 0x249   : > { %v628_v46 = vpop.f32.mrf.mxu0  ;;  %v669_v47 = vpop.f32.mrf.mxu1 }
 0x24a   : > { %1802 = vtanh.f32 %v679_v45 }
 0x24b   : > { %1804 = vtanh.f32 %v673_v48 }
 0x24c   : > { %1806 = vtanh.f32 %v684_v50 }
 0x255   : > { %v1801_v51 = vpop.eup %1800 }
 0x256   : > { %v677_v52 = vmul.f32 0.5, %v1801_v51 }
 0x257   : > { %v1803_v53 = vpop.eup %1802 }
 0x258   : > { %v678_v54 = vadd.f32 0.5, %v677_v52  ;;  %v681_v55 = vmul.f32 0.5, %v1803_v53  ;;  %v1805_v57 = vpop.eup %1804 }
 0x259   : > { %v1807_v61 = vpop.eup %1806 }
 0x25a   : > { %v682_v56 = vadd.f32 0.5, %v681_v55  ;;  %v689_v59 = vmul.f32 %v1805_v57, %v678_v54  ;;  %v686_v62 = vmul.f32 0.5, %v1807_v61 }
 0x25c   : > { %v688_v58 = vmul.f32 %v682_v56, %v2475_v15  ;;  %v687_v63 = vadd.f32 0.5, %v686_v62 }
 0x25e   : > { %v690_v60 = vadd.f32 %v689_v59, %v688_v58 }
 0x260   : > { %1808 = vtanh.f32 %v690_v60 }
 0x26d   : > { %v1809_v0 = vpop.eup %1808 }
 0x26e   : > { %v692_v1 = vmul.f32 %v1809_v0, %v687_v63 }
 0x270   : > { %v694_v34 = vpack.c.bf16 %v692_v1, %v692_v1 }
 0x272   : > { %695 = vst [vmem:[#allocation2] sm:$0xf] %v694_v34 }
 0x279   : > { %v696_v36 = vld [vmem:[#allocation2] sm:$0xf] }
 0x27a   : > { %738 = vmatmul.mubr.bf16.vlgmr.msra.gmra.mxu0 %v696_v36  ;;  %779 = vmatmul.mubr.bf16.vlgmr.msra.gmra.mxu1 %v696_v36 }
 0x33a   : > { %v739_v8 = vpop.f32.mrf.mxu0  ;;  %v780_v13 = vpop.f32.mrf.mxu1 }
 0x33b   : > { %v787_v14 = vadd.f32 %v739_v8, %v701_v5  ;;  %v789_v19 = vadd.f32 %v780_v13, %v703_v11 }
 0x33c   : > { %v741_v12 = vpop.f32.mrf.mxu0  ;;  %v782_v15 = vpop.f32.mrf.mxu1 }
 0x33d   : > { %v791_v6 = vmul.f32 0.5, %v787_v14  ;;  %v788_v2 = vadd.f32 %v741_v12, %v702_v9  ;;  %v790_v21 = vadd.f32 %v782_v15, %v704_v20 }
 0x33e   : > { %v743_v10 = vpop.f32.mrf.mxu0  ;;  %v784_v16 = vpop.f32.mrf.mxu1 }
 0x33f   : > { %1810 = vtanh.f32 %v791_v6  ;;  %v795_v17 = vmul.f32 0.5, %v788_v2  ;;  %v800_v23 = vmul.f32 0.5, %v790_v21 }
 0x340   : > { %v744_v18 = vpop.f32.mrf.mxu0  ;;  %v785_v3 = vpop.f32.mrf.mxu1 }
 0x341   : > { %1812 = vtanh.f32 %v795_v17 }
 0x342   : > { %1814 = vtanh.f32 %v789_v19 }
 0x343   : > { %1816 = vtanh.f32 %v800_v23 }
 0x34c   : > { %v1811_v25 = vpop.eup %1810 }
 0x34d   : > { %v793_v35 = vmul.f32 0.5, %v1811_v25 }
 0x34e   : > { %v1813_v37 = vpop.eup %1812 }
 0x34f   : > { %v794_v38 = vadd.f32 0.5, %v793_v35  ;;  %v797_v39 = vmul.f32 0.5, %v1813_v37  ;;  %v1815_v41 = vpop.eup %1814 }
 0x350   : > { %v1817_v46 = vpop.eup %1816 }
 0x351   : > { %v798_v40 = vadd.f32 0.5, %v797_v39  ;;  %v805_v43 = vmul.f32 %v1815_v41, %v794_v38  ;;  %v802_v47 = vmul.f32 0.5, %v1817_v46 }
 0x353   : > { %v804_v42 = vmul.f32 %v798_v40, %v690_v60  ;;  %v803_v48 = vadd.f32 0.5, %v802_v47 }
 0x355   : > { %v806_v45 = vadd.f32 %v805_v43, %v804_v42 }
 0x357   : > { %1818 = vtanh.f32 %v806_v45  ;;  %809 = vst [vmem:[#allocation3] sm:$0xff] %v806_v45 }
 0x364   : > { %v1819_v44 = vpop.eup %1818 }
 0x365   : > { %v808_v49 = vmul.f32 %v1819_v44, %v803_v48 }
 0x367   : > { %v810_v50 = vpack.c.bf16 %v808_v49, %v808_v49 }
 0x369   : > { %811 = vst [vmem:[#allocation2] sm:$0xf] %v810_v50 }
 0x36a PF: > { %p1641_p2 = scmp.ne.s32.totalorder %s2096_s22, 2 }
 0x36c   : > { %815 = sbr.rel (%p1641_p2) target bundleno = 1614 (0x64e), region = 64 }
 0x371   : > { %v2518_v51 = vcombine.high %v2266_v30, %v2270_v32  ;;  %v2522_v52 = vcombine.low %v2266_v30, %v2270_v32  ;;  %v2526_v53 = vcombine.high %v2268_v31, %v2272_v33  ;;  %v2530_v54 = vcombine.low %v2268_v31, %v2272_v33  ;;  %v2753_v33 = vld [vmem:[#allocation35_spill] sm:$0xff]  ;;  %v2754_v57 = vld [vmem:[#allocation34_spill] sm:$0xff]  ;;  %v2757_v61 = vld [vmem:[#allocation33_spill] sm:$0xff] }
 0x372   : > { %v2534_v55 = vcombine.high %v2258_v26, %v2262_v28  ;;  %v2538_v56 = vcombine.high %v2260_v27, %v2264_v29  ;;  %v2546_v30 = vcombine.low %v2258_v26, %v2262_v28  ;;  %v2550_v31 = vcombine.low %v2260_v27, %v2264_v29  ;;  %v2755_v28 = vld [vmem:[#allocation32_spill] sm:$0xff]  ;;  %v2756_v29 = vld [vmem:[#allocation30_spill] sm:$0xff]  ;;  %v2758_v62 = vld [vmem:[#allocation31_spill] sm:$0xff] }
 0x373   : > { %984 = vmatprep.subr.bf16.mxu0 %v2518_v51  ;;  %1025 = vmatprep.subr.bf16.mxu1 %v2526_v53  ;;  %v2556_v32 = vcombine.high %v2250_v22, %v2254_v24  ;;  %v2560_v58 = vcombine.high %v2754_v57, %v2753_v33  ;;  %v2045_v59 = vmov 0   ;;  %v1662_v26 = vcombine.low %v2250_v22, %v2254_v24  ;;  %v2759_v0 = vld [vmem:[#allocation28_spill] sm:$0xff]  ;;  %v2760_v1 = vld [vmem:[#allocation26_spill] sm:$0xff]  ;;  %v2761_v36 = vld [vmem:[#allocation29_spill] sm:$0xff] }
 0x374   : > { %985 = vmatpush1.bf16.msra.mxu0 %v2522_v52  ;;  %1026 = vmatpush1.bf16.msra.mxu1 %v2530_v54  ;;  %v1664_v27 = vcombine.low %v2754_v57, %v2753_v33  ;;  %v1659_v60 = vcombine.high %v2756_v29, %v2755_v28  ;;  %v1661_v63 = vcombine.high %v2758_v62, %v2757_v61  ;;  %v2762_v7 = vld [vmem:[#allocation27_spill] sm:$0xff]  ;;  %v2763_v4 = vld [vmem:[#allocation24_spill] sm:$0xff]  ;;  %v2764_v13 = vld [vmem:[#allocation22_spill] sm:$0xff] }
 0x375   : > { %986 = vmatprep.subr.bf16.mxu0 %v2534_v55  ;;  %1027 = vmatprep.subr.bf16.mxu1 %v2538_v56  ;;  %v1658_v22 = vcombine.low %v2756_v29, %v2755_v28  ;;  %v1660_v24 = vcombine.low %v2758_v62, %v2757_v61  ;;  %v1655_v34 = vcombine.high %v2760_v1, %v2759_v0  ;;  %v2765_v12 = vld [vmem:[#allocation25_spill] sm:$0xff]  ;;  %v2766_v15 = vld [vmem:[#allocation23_spill] sm:$0xff]  ;;  %v2767_v10 = vld [vmem:[#allocation20_spill] sm:$0xff] }
 0x376   : > { %1016 = vmatprep.mubr.bf16.mxu0 %v2045_v59  ;;  %1057 = vmatprep.mubr.bf16.mxu1 %v2045_v59  ;;  %v1657_v5 = vcombine.high %v2762_v7, %v2761_v36  ;;  %v1654_v9 = vcombine.low %v2760_v1, %v2759_v0  ;;  %v1656_v8 = vcombine.low %v2762_v7, %v2761_v36  ;;  %v2768_v16 = vld [vmem:[#allocation18_spill] sm:$0xff]  ;;  %v2769_v18 = vld [vmem:[#allocation21_spill] sm:$0xff]  ;;  %v2770_v3 = vld [vmem:[#allocation19_spill] sm:$0xff] }
 0x377   : > { %1820 = vset.pattern.permute.xlu0 %v2045_v59  ;;  %v1651_v14 = vcombine.high %v2764_v13, %v2763_v4  ;;  %v1653_v6 = vcombine.high %v2766_v15, %v2765_v12  ;;  %v1650_v11 = vcombine.low %v2764_v13, %v2763_v4  ;;  %v1652_v2 = vcombine.low %v2766_v15, %v2765_v12  ;;  %v2771_v23 = vld [vmem:[#allocation16_spill] sm:$0xff]  ;;  %v2772_v25 = vld [vmem:[#allocation14_spill] sm:$0xff]  ;;  %v2773_v37 = vld [vmem:[#allocation17_spill] sm:$0xff] }
 0x378   : > { %987 = vmatpush1.bf16.msra.mxu0 %v2546_v30  ;;  %1028 = vmatpush1.bf16.msra.mxu1 %v2550_v31  ;;  %v1647_v17 = vcombine.high %v2768_v16, %v2767_v10  ;;  %v1649_v19 = vcombine.high %v2770_v3, %v2769_v18  ;;  %v1646_v20 = vcombine.low %v2768_v16, %v2767_v10  ;;  %v2774_v38 = vld [vmem:[#allocation15_spill] sm:$0xff]  ;;  %v816_v42 = vld [vmem:[#allocation2] sm:$0xf]  ;;  %v1821_v15 = vld [vmem:[#allocation9 + $0xe0] ss:$16 sps:$4 sm:$0xff]  }
 0x379   : > { %988 = vmatprep.subr.bf16.mxu0 %v2556_v32  ;;  %1029 = vmatprep.subr.bf16.mxu1 %v2560_v58  ;;  %v1648_v21 = vcombine.low %v2770_v3, %v2769_v18  ;;  %v1643_v35 = vcombine.high %v2772_v25, %v2771_v23  ;;  %v1645_v39 = vcombine.high %v2774_v38, %v2773_v37  ;;  %v1209_v43 = vld [vmem:[%s2668_s2] sm:$0xff]  ;;  %v1826_v12 = vld [vmem:[#allocation9 + $0xec] ss:$16 sps:$4 sm:$0xff]   ;;  %v1827_v10 = vld [vmem:[#allocation9 + $0xc0] ss:$16 sps:$4 sm:$0xff]  }
 0x37a   : > { %v1642_v40 = vcombine.low %v2772_v25, %v2771_v23  ;;  %v1644_v41 = vcombine.low %v2774_v38, %v2773_v37  ;;  %1212 = vperm.xlu0 %1820, %v1209_v43   ;;  %v818_v45 = vld [vmem:[%s2198_s10] sm:$0xff]  ;;  %v819_v47 = vld [vmem:[%s2198_s10 + $0x8] sm:$0xff] }
 0x37b   : > { %v820_v46 = vunpack.c.l.bf16 %v818_v45  ;;  %v821_v48 = vunpack.c.h.bf16 %v818_v45  ;;  %v1830_v16 = vld [vmem:[#allocation9 + $0xc8] ss:$16 sps:$4 sm:$0xff]   ;;  %v1838_v18 = vld [vmem:[#allocation9 + $0xac] ss:$16 sps:$4 sm:$0xff]   ;;  %v1833_v3 = vld [vmem:[#allocation9 + $0xa0] ss:$16 sps:$4 sm:$0xff]  }
 0x37c   : > { %989 = vmatpush1.bf16.msra.mxu0 %v1662_v26  ;;  %1030 = vmatpush1.bf16.msra.mxu1 %v1664_v27  ;;  %v1842_v23 = vld [vmem:[#allocation9 + $0x88] ss:$16 sps:$4 sm:$0xff]   ;;  %v1847_v25 = vld [vmem:[#allocation9 + $0x64] ss:$16 sps:$4 sm:$0xff]   ;;  %v1845_v37 = vld [vmem:[#allocation9 + $0x60] ss:$16 sps:$4 sm:$0xff]  }
 0x37d   : > { %990 = vmatprep.subr.bf16.mxu0 %v1659_v60  ;;  %1031 = vmatprep.subr.bf16.mxu1 %v1661_v63  ;;  %v1848_v38 = vld [vmem:[#allocation9 + $0x68] ss:$16 sps:$4 sm:$0xff]   ;;  %v1859_v43 = vld [vmem:[#allocation9 + $0x24] ss:$16 sps:$4 sm:$0xff]   ;;  %v1862_v45 = vld [vmem:[#allocation9 + $0x2c] ss:$16 sps:$4 sm:$0xff]  }
 0x380   : > { %991 = vmatpush1.bf16.msra.mxu0 %v1658_v22  ;;  %1032 = vmatpush1.bf16.msra.mxu1 %v1660_v24 }
 0x381   : > { %992 = vmatprep.subr.bf16.mxu0 %v1655_v34  ;;  %1033 = vmatprep.subr.bf16.mxu1 %v1657_v5 }
 0x384   : > { %993 = vmatpush1.bf16.msra.mxu0 %v1654_v9  ;;  %1034 = vmatpush1.bf16.msra.mxu1 %v1656_v8 }
 0x385   : > { %994 = vmatprep.subr.bf16.mxu0 %v1651_v14  ;;  %1035 = vmatprep.subr.bf16.mxu1 %v1653_v6 }
 0x388   : > { %995 = vmatpush1.bf16.msra.mxu0 %v1650_v11  ;;  %1036 = vmatpush1.bf16.msra.mxu1 %v1652_v2 }
 0x389   : > { %996 = vmatprep.subr.bf16.mxu0 %v1647_v17  ;;  %1037 = vmatprep.subr.bf16.mxu1 %v1649_v19 }
 0x38c   : > { %997 = vmatpush1.bf16.msra.mxu0 %v1646_v20  ;;  %1038 = vmatpush1.bf16.msra.mxu1 %v1648_v21 }
 0x38d   : > { %998 = vmatprep.subr.bf16.mxu0 %v1643_v35  ;;  %1039 = vmatprep.subr.bf16.mxu1 %v1645_v39 }
 0x390   : > { %999 = vmatpush1.bf16.msra.mxu0 %v1642_v40  ;;  %1040 = vmatpush1.bf16.msra.mxu1 %v1644_v41 }
 0x391   : > { %1100 = vmatprep.subr.bf16.mxu0 %v2518_v51  ;;  %1141 = vmatprep.subr.bf16.mxu1 %v2526_v53  ;;  %v822_v51 = vunpack.c.l.bf16 %v819_v47 }
 0x393   : > { %1017 = vmatmul.mubr.bf16.vlgmr.msra.gmra.mxu0 %v816_v42  ;;  %1058 = vmatmul.mubr.bf16.vlgmr.msra.gmra.mxu1 %v816_v42  ;;  %v1856_v42 = vld [vmem:[#allocation9 + $0x4c] ss:$16 sps:$4 sm:$0xff]  }
 0x394   : > { %1101 = vmatpush1.bf16.msra.mxu0 %v2522_v52  ;;  %1142 = vmatpush1.bf16.msra.mxu1 %v2530_v54 }
 0x395   : > { %1102 = vmatprep.subr.bf16.mxu0 %v2534_v55  ;;  %1143 = vmatprep.subr.bf16.mxu1 %v2538_v56 }
 0x396   : > { %1132 = vmatprep.mubr.bf16.mxu0 %v2045_v59  ;;  %1173 = vmatprep.mubr.bf16.mxu1 %v2045_v59 }
 0x398   : > { %1103 = vmatpush1.bf16.msra.mxu0 %v2546_v30  ;;  %1144 = vmatpush1.bf16.msra.mxu1 %v2550_v31 }
 0x399   : > { %1104 = vmatprep.subr.bf16.mxu0 %v2556_v32  ;;  %1145 = vmatprep.subr.bf16.mxu1 %v2560_v58  ;;  %v823_v58 = vunpack.c.h.bf16 %v819_v47  ;;  %v1860_v47 = vld [vmem:[#allocation9 + $0x28] ss:$16 sps:$4 sm:$0xff]  }
 0x39c   : > { %1105 = vmatpush1.bf16.msra.mxu0 %v1662_v26  ;;  %1146 = vmatpush1.bf16.msra.mxu1 %v1664_v27 }
 0x39d   : > { %1106 = vmatprep.subr.bf16.mxu0 %v1659_v60  ;;  %1147 = vmatprep.subr.bf16.mxu1 %v1661_v63 }
 0x3a0   : > { %1107 = vmatpush1.bf16.msra.mxu0 %v1658_v22  ;;  %1148 = vmatpush1.bf16.msra.mxu1 %v1660_v24  ;;  %v817_v22 = vld [vmem:[#allocation3] sm:$0xff] }
 0x3a1   : > { %1108 = vmatprep.subr.bf16.mxu0 %v1655_v34  ;;  %1149 = vmatprep.subr.bf16.mxu1 %v1657_v5 }
 0x3a4   : > { %1109 = vmatpush1.bf16.msra.mxu0 %v1654_v9  ;;  %1150 = vmatpush1.bf16.msra.mxu1 %v1656_v8 }
 0x3a5   : > { %1110 = vmatprep.subr.bf16.mxu0 %v1651_v14  ;;  %1151 = vmatprep.subr.bf16.mxu1 %v1653_v6  ;;  %v1823_v14 = vld [vmem:[#allocation9 + $0xe4] ss:$16 sps:$4 sm:$0xff]   ;;  %v1824_v6 = vld [vmem:[#allocation9 + $0xe8] ss:$16 sps:$4 sm:$0xff]  }
 0x3a8   : > { %1111 = vmatpush1.bf16.msra.mxu0 %v1650_v11  ;;  %1152 = vmatpush1.bf16.msra.mxu1 %v1652_v2  ;;  %v1829_v11 = vld [vmem:[#allocation9 + $0xc4] ss:$16 sps:$4 sm:$0xff]   ;;  %v1832_v2 = vld [vmem:[#allocation9 + $0xcc] ss:$16 sps:$4 sm:$0xff]  }
 0x3a9   : > { %1112 = vmatprep.subr.bf16.mxu0 %v1647_v17  ;;  %1153 = vmatprep.subr.bf16.mxu1 %v1649_v19  ;;  %v1835_v17 = vld [vmem:[#allocation9 + $0xa4] ss:$16 sps:$4 sm:$0xff]  }
 0x3aa   : > { %v1841_v19 = vld [vmem:[#allocation9 + $0x84] ss:$16 sps:$4 sm:$0xff]  }
 0x3ac   : > { %1113 = vmatpush1.bf16.msra.mxu0 %v1646_v20  ;;  %1154 = vmatpush1.bf16.msra.mxu1 %v1648_v21  ;;  %v1844_v20 = vld [vmem:[#allocation9 + $0x8c] ss:$16 sps:$4 sm:$0xff]   ;;  %v1839_v21 = vld [vmem:[#allocation9 + $0x80] ss:$16 sps:$4 sm:$0xff]  }
 0x3ad   : > { %1114 = vmatprep.subr.bf16.mxu0 %v1643_v35  ;;  %1155 = vmatprep.subr.bf16.mxu1 %v1645_v39  ;;  %v1850_v35 = vld [vmem:[#allocation9 + $0x6c] ss:$16 sps:$4 sm:$0xff]   ;;  %v1851_v39 = vld [vmem:[#allocation9 + $0x40] ss:$16 sps:$4 sm:$0xff]  }
 0x3b0   : > { %1115 = vmatpush1.bf16.msra.mxu0 %v1642_v40  ;;  %1156 = vmatpush1.bf16.msra.mxu1 %v1644_v41  ;;  %v1853_v40 = vld [vmem:[#allocation9 + $0x44] ss:$16 sps:$4 sm:$0xff]   ;;  %v1854_v41 = vld [vmem:[#allocation9 + $0x48] ss:$16 sps:$4 sm:$0xff]  }
 0x3b1   : > { %1431 = vmatprep.subr.bf16.mxu0 %v1823_v14  ;;  %1472 = vmatprep.subr.bf16.mxu1 %v1826_v12 }
 0x453   : > { %v1018_v44 = vpop.f32.mrf.mxu0  ;;  %v1059_v49 = vpop.f32.mrf.mxu1 }
 0x454   : > { %v1066_v50 = vadd.f32 %v1018_v44, %v820_v46  ;;  %v1068_v32 = vadd.f32 %v1059_v49, %v822_v51  ;;  %v1857_v46 = vld [vmem:[#allocation9 + $0x20] ss:$16 sps:$4 sm:$0xff]   ;;  %v1868_v44 = vld [vmem:[#allocation9 + $0xc] ss:$16 sps:$4 sm:$0xff]  }
 0x455   : > { %v1020_v52 = vpop.f32.mrf.mxu0  ;;  %v1061_v53 = vpop.f32.mrf.mxu1  ;;  %v1863_v49 = vld [vmem:[#allocation9] ss:$16 sps:$4 sm:$0xff]  }
 0x456   : > { %v1070_v54 = vmul.f32 0.5, %v1066_v50  ;;  %v1067_v55 = vadd.f32 %v1020_v52, %v821_v48  ;;  %v1069_v26 = vadd.f32 %v1061_v53, %v823_v58  ;;  %v1865_v48 = vld [vmem:[#allocation9 + $0x4] ss:$16 sps:$4 sm:$0xff]   ;;  %v1866_v50 = vld [vmem:[#allocation9 + $0x8] ss:$16 sps:$4 sm:$0xff]  }
 0x457   : > { %v1022_v56 = vpop.f32.mrf.mxu0  ;;  %v1063_v30 = vpop.f32.mrf.mxu1  ;;  %v1674_v51 = vld [vmem:[%s2198_s10 + $0x10] sm:$0xff] }
 0x458   : > { %1869 = vtanh.f32 %v1070_v54  ;;  %v1074_v31 = vmul.f32 0.5, %v1067_v55  ;;  %v1079_v27 = vmul.f32 0.5, %v1069_v26  ;;  %v1096_v52 = vunpack.c.l.bf16 %v1674_v51  ;;  %v1675_v55 = vld [vmem:[%s2198_s10 + $0x18] sm:$0xff] }
 0x459   : > { %v1023_v33 = vpop.f32.mrf.mxu0  ;;  %v1064_v57 = vpop.f32.mrf.mxu1  ;;  %v1097_v53 = vunpack.c.h.bf16 %v1674_v51 }
 0x45a   : > { %1871 = vtanh.f32 %v1074_v31  ;;  %v1098_v57 = vunpack.c.l.bf16 %v1675_v55 }
 0x45b   : > { %1873 = vtanh.f32 %v1068_v32 }
 0x45c   : > { %1875 = vtanh.f32 %v1079_v27 }
 0x465   : > { %v1870_v28 = vpop.eup %1869 }
 0x466   : > { %v1072_v29 = vmul.f32 0.5, %v1870_v28 }
 0x467   : > { %v1872_v60 = vpop.eup %1871 }
 0x468   : > { %v1073_v61 = vadd.f32 0.5, %v1072_v29  ;;  %v1076_v62 = vmul.f32 0.5, %v1872_v60  ;;  %v1874_v63 = vpop.eup %1873 }
 0x469   : > { %v1876_v36 = vpop.eup %1875 }
 0x46a   : > { %v1077_v24 = vadd.f32 0.5, %v1076_v62  ;;  %v1084_v1 = vmul.f32 %v1874_v63, %v1073_v61  ;;  %v1081_v7 = vmul.f32 0.5, %v1876_v36  ;;  %v1099_v62 = vunpack.c.h.bf16 %v1675_v55 }
 0x46c   : > { %v1083_v0 = vmul.f32 %v1077_v24, %v817_v22  ;;  %v1082_v5 = vadd.f32 0.5, %v1081_v7 }
 0x46e   : > { %v2630_v34 = vadd.f32 %v1084_v1, %v1083_v0 }
 0x470   : > { %1877 = vtanh.f32 %v2630_v34 }
 0x47d   : > { %v1878_v9 = vpop.eup %1877 }
 0x47e   : > { %v1087_v8 = vmul.f32 %v1878_v9, %v1082_v5 }
 0x480   : > { %v1089_v4 = vpack.c.bf16 %v1087_v8, %v1087_v8 }
 0x482   : > { %1090 = vst [vmem:[#allocation2] sm:$0xf] %v1089_v4 }
 0x489   : > { %v1091_v13 = vld [vmem:[#allocation2] sm:$0xf] }
 0x48a   : > { %1133 = vmatmul.mubr.bf16.vlgmr.msra.gmra.mxu0 %v1091_v13  ;;  %1174 = vmatmul.mubr.bf16.vlgmr.msra.gmra.mxu1 %v1091_v13 }
 0x48b   : > { %1463 = vmatprep.mubr.bf16.mxu0 %v2045_v59  ;;  %1504 = vmatprep.mubr.bf16.mxu1 %v2045_v59  ;;  %v1836_v59 = vld [vmem:[#allocation9 + $0xa8] ss:$16 sps:$4 sm:$0xff]  }
 0x48c   : > { %1432 = vmatpush1.bf16.msra.mxu0 %v1821_v15  ;;  %1473 = vmatpush1.bf16.msra.mxu1 %v1824_v6 }
 0x48d   : > { %1433 = vmatprep.subr.bf16.mxu0 %v1829_v11  ;;  %1474 = vmatprep.subr.bf16.mxu1 %v1832_v2 }
 0x490   : > { %1434 = vmatpush1.bf16.msra.mxu0 %v1827_v10  ;;  %1475 = vmatpush1.bf16.msra.mxu1 %v1830_v16  ;;  %v1213_v10 = vpop.permute.xlu0 %1212 }
 0x491   : > { %1435 = vmatprep.subr.bf16.mxu0 %v1835_v17  ;;  %1476 = vmatprep.subr.bf16.mxu1 %v1838_v18 }
 0x494   : > { %1436 = vmatpush1.bf16.msra.mxu0 %v1833_v3  ;;  %1477 = vmatpush1.bf16.msra.mxu1 %v1836_v59  ;;  %v1251_v59 = vlaneseq }
 0x495   : > { %1437 = vmatprep.subr.bf16.mxu0 %v1841_v19  ;;  %1478 = vmatprep.subr.bf16.mxu1 %v1844_v20 }
 0x498   : > { %1438 = vmatpush1.bf16.msra.mxu0 %v1839_v21  ;;  %1479 = vmatpush1.bf16.msra.mxu1 %v1842_v23  ;;  %v1249_v21 = vld [vmem:[%s2670_s4] sm:$0xf] }
 0x499   : > { %1439 = vmatprep.subr.bf16.mxu0 %v1847_v25  ;;  %1480 = vmatprep.subr.bf16.mxu1 %v1850_v35 }
 0x49c   : > { %1440 = vmatpush1.bf16.msra.mxu0 %v1845_v37  ;;  %1481 = vmatpush1.bf16.msra.mxu1 %v1848_v38 }
 0x49d   : > { %1441 = vmatprep.subr.bf16.mxu0 %v1853_v40  ;;  %1482 = vmatprep.subr.bf16.mxu1 %v1856_v42 }
 0x4a0   : > { %1442 = vmatpush1.bf16.msra.mxu0 %v1851_v39  ;;  %1483 = vmatpush1.bf16.msra.mxu1 %v1854_v41 }
 0x4a1   : > { %1443 = vmatprep.subr.bf16.mxu0 %v1859_v43  ;;  %1484 = vmatprep.subr.bf16.mxu1 %v1862_v45 }
 0x4a4   : > { %1444 = vmatpush1.bf16.msra.mxu0 %v1857_v46  ;;  %1485 = vmatpush1.bf16.msra.mxu1 %v1860_v47 }
 0x4a5   : > { %1445 = vmatprep.subr.bf16.mxu0 %v1865_v48  ;;  %1486 = vmatprep.subr.bf16.mxu1 %v1868_v44 }
 0x4a8   : > { %1446 = vmatpush1.bf16.msra.mxu0 %v1863_v49  ;;  %1487 = vmatpush1.bf16.msra.mxu1 %v1866_v50 }
 0x54a   : > { %v1134_v54 = vpop.f32.mrf.mxu0  ;;  %v1175_v56 = vpop.f32.mrf.mxu1 }
 0x54b   : > { %v1182_v30 = vadd.f32 %v1134_v54, %v1096_v52  ;;  %v1184_v61 = vadd.f32 %v1175_v56, %v1098_v57 }
 0x54c   : > { %v1136_v31 = vpop.f32.mrf.mxu0  ;;  %v1177_v32 = vpop.f32.mrf.mxu1 }
 0x54d   : > { %v1186_v33 = vmul.f32 0.5, %v1182_v30  ;;  %v1183_v58 = vadd.f32 %v1136_v31, %v1097_v53  ;;  %v1185_v63 = vadd.f32 %v1177_v32, %v1099_v62 }
 0x54e   : > { %v1138_v26 = vpop.f32.mrf.mxu0  ;;  %v1179_v27 = vpop.f32.mrf.mxu1 }
 0x54f   : > { %1879 = vtanh.f32 %v1186_v33  ;;  %v1190_v28 = vmul.f32 0.5, %v1183_v58  ;;  %v1195_v22 = vmul.f32 0.5, %v1185_v63 }
 0x550   : > { %v1139_v29 = vpop.f32.mrf.mxu0  ;;  %v1180_v60 = vpop.f32.mrf.mxu1 }
 0x551   : > { %1881 = vtanh.f32 %v1190_v28 }
 0x552   : > { %1883 = vtanh.f32 %v1184_v61 }
 0x553   : > { %1885 = vtanh.f32 %v1195_v22 }
 0x55c   : > { %v1880_v24 = vpop.eup %1879 }
 0x55d   : > { %v1188_v0 = vmul.f32 0.5, %v1880_v24 }
 0x55e   : > { %v1882_v1 = vpop.eup %1881 }
 0x55f   : > { %v1189_v36 = vadd.f32 0.5, %v1188_v0  ;;  %v1192_v7 = vmul.f32 0.5, %v1882_v1  ;;  %v1884_v9 = vpop.eup %1883 }
 0x560   : > { %v1886_v14 = vpop.eup %1885 }
 0x561   : > { %v1193_v5 = vadd.f32 0.5, %v1192_v7  ;;  %v1200_v4 = vmul.f32 %v1884_v9, %v1189_v36  ;;  %v1197_v12 = vmul.f32 0.5, %v1886_v14 }
 0x563   : > { %v1199_v8 = vmul.f32 %v1193_v5, %v2630_v34  ;;  %v1198_v15 = vadd.f32 0.5, %v1197_v12  ;;  %v1252_v34 = vshrl.u32 %v1251_v59, 7 }
 0x565   : > { %v1201_v13 = vadd.f32 %v1200_v4, %v1199_v8  ;;  %v1253_v19 = vsub.s32 0, %v1252_v34  ;;  %v1261_v20 = vsub.s32 2, %v1252_v34  ;;  %v1257_v23 = vsub.s32 1, %v1252_v34 }
 0x566   : > { %v1265_v25 = vsub.s32 3, %v1252_v34 }
 0x567   : > { %1887 = vtanh.f32 %v1201_v13  ;;  %1204 = vst [vmem:[#allocation3] sm:$0xff] %v1201_v13  ;;  %v1254_v35 = vrot.slane %v1249_v21, %v1253_v19  ;;  %v1262_v37 = vrot.slane %v1249_v21, %v1261_v20  ;;  %v1258_v38 = vrot.slane %v1249_v21, %v1257_v23 }
 0x568   : > { %v1266_v39 = vrot.slane %v1249_v21, %v1265_v25 }
 0x574   : > { %v1888_v6 = vpop.eup %1887 }
 0x575   : > { %v1203_v11 = vmul.f32 %v1888_v6, %v1198_v15 }
 0x577   : > { %v1205_v2 = vpack.c.bf16 %v1203_v11, %v1203_v11 }
 0x579   : > { %1206 = vst [vmem:[#allocation2] sm:$0xf] %v1205_v2 }
 0x580   : > { %v1207_v16 = vld [vmem:[#allocation2] sm:$0xf] }
 0x581   : > { %v1208_v17 = vunpack.c.l.bf16 %v1207_v16 }
 0x583   : > { %v1215_v18 = vmul.f32 %v1213_v10, %v1208_v17 }
 0x585   : > { %v1216_v3 = vpack.c.bf16 %v1215_v18, %v1215_v18 }
 0x587   : > { %1464 = vmatmul.mubr.bf16.vlgmr.msra.gmra.mxu0 %v1216_v3  ;;  %1505 = vmatmul.mubr.bf16.vlgmr.msra.gmra.mxu1 %v1216_v3 }
 0x647   : > { %v1465_v40 = vpop.f32.mrf.mxu0  ;;  %v1506_v41 = vpop.f32.mrf.mxu1 }
 0x648   : > { %v1466_v42 = vadd.f32 %v1465_v40, %v1254_v35  ;;  %v1507_v43 = vadd.f32 %v1506_v41, %v1262_v37 }
 0x649   : > { %v1467_v45 = vpop.f32.mrf.mxu0  ;;  %v1508_v46 = vpop.f32.mrf.mxu1 }
 0x64a   : > { %1513 = vst [vmem:[#allocation10] sm:$0xff] %v1466_v42  ;;  %1515 = vst [vmem:[#allocation10 + $0x10] sm:$0xff] %v1507_v43  ;;  %v1468_v47 = vadd.f32 %v1467_v45, %v1258_v38  ;;  %v1509_v48 = vadd.f32 %v1508_v46, %v1266_v39 }
 0x64b   : > { %v1469_v44 = vpop.f32.mrf.mxu0  ;;  %v1510_v49 = vpop.f32.mrf.mxu1 }
 0x64c   : > { %1514 = vst [vmem:[#allocation10 + $0x8] sm:$0xff] %v1468_v47  ;;  %1516 = vst [vmem:[#allocation10 + $0x18] sm:$0xff] %v1509_v48 }
 0x64d   : > { %v1470_v50 = vpop.f32.mrf.mxu0  ;;  %v1511_v51 = vpop.f32.mrf.mxu1 }
 0x64e PF: > { %p1747_p9 = scmp.eq.s32.totalorder %s2096_s22, 2  ;;  %s2046_s26 = smov [#allocation10]  }
 0x64f   : > { %s1524_s29 = sshll.u32 %s2046_s26, 4  ;;  %s1525_s29 = int_to_ptr.vmem [resolvable:$true] %s1524_s29 }
 0x650   : > { %s1969_s8 = scalar_lea.vmem %s1525_s29, 512  ;;  %p1976_p11 = scmp.lt.s32.totalorder %s1525_s29, %s1525_s29 }
 0x651   : > { %p1970_p3 = scmp.ne.s32.totalorder %s1525_s29, %s1969_s8  ;;  %p1977_p8 = scmp.lt.s32.totalorder %s1969_s8, %s1969_s8 }
 0x653   : > { %p1971_p7 = pnand %p1970_p3, %p1747_p9  ;;  %p1978_p0 = por %p1977_p8, %p1976_p11 }
 0x655   : > { %p1972_p10 = pneg %p1971_p7 }
 0x657   : > { %p1979_p4 = pnand %p1978_p0, %p1972_p10 }
 0x659   : > { %1982 = shalt.err (!%p1979_p4)
}
 0x65a   : > { %1728 = dma.vmem_to_hbm [thread:$0]  (%p1747_p9), %s1525_s29, 512, %s2671_s5, [#allocation6]  }
 0x65b   : > { %2018 = dma.done.wait (%p1747_p9), [#allocation6], 512  }
 0x65c   : > { %2020 = vsyncadd (%p1747_p9), [#allocation6], 4294966784 }
 0x65d PF: > { %p17_p1 = scmp.ge.s32.totalorder %s2146_s13, 5   ;;  %s2775_s18 = smov %s2027_s19 }
 0x65e   : > { %s2776_s19 = smov %s2031_s20  ;;  %s2777_s20 = smov %s2157_s17 }
 0x65f   : > { %s2778_s21 = smov %s2146_s13  ;;  %19 = sbr.rel (!%p17_p1) target bundleno = 5 (0x5), region = 100 }
 0x664   :  { %1537 = vsyncpa [#allocation5], 1 }
 0x665   :  { %1539 = vsyncpa [#allocation5 + $0x1], 1 }
 0x666   :  { %1540 = vsyncpa [#allocation8], 1 }
 0x667   :  { %1541 = vsyncpa [#allocation6], 1 }
 0x668   :  { %1543 = vsyncpa [#allocation6 + $0x1], 1 }

</bundles_post_ra>
